<compile_context>
chip_gen: v5e
topology: v5e:2x2
jax: 0.10.0
libtpu: 0.0.40
codegen_flags: <defaults>
</compile_context>

<pallas_src>
import jax
import jax.numpy as jnp
from jax.experimental import pallas as pl
from jax.experimental.pallas import tpu as pltpu


def _round_up(n, m):
    return ((n + m - 1) // m) * m


def _moe_fused_kernel(x_ref, wg_ref, bg_ref, w1_ref, b1_ref, expand_ref,
                      w2_ref, b2_ref, out_ref, gate_ref):
    """One token tile: gating + all experts fused into two wide matmuls."""
    xv = x_ref[...]                                               # (TM, Dp)
    xf = xv.astype(jnp.float32)

    # ---- gating (fully f32; padded lanes carry a -1e30 bias -> softmax 0) --
    logits = jnp.dot(xf, wg_ref[...],
                     preferred_element_type=jnp.float32) + bg_ref[...]  # (TM, Ep)
    m = jnp.max(logits, axis=-1, keepdims=True)
    p = jnp.exp(logits - m)
    denom = jnp.sum(p, axis=-1, keepdims=True)
    gate = p * pl.reciprocal(denom, approx=False)                 # (TM, Ep)
    gate_ref[...] = gate.astype(gate_ref.dtype)                   # lane-dense store

    # ---- all experts fused: relu(x @ W1_all + b1_all) ----------------------
    xb = xv.astype(jnp.bfloat16)                                  # cast once per tile
    h = jnp.dot(xb, w1_ref[...], preferred_element_type=jnp.float32)
    h = jnp.maximum(h + b1_ref[...], 0.0)                         # (TM, EHp) f32

    # Broadcast each expert's gate score across its H hidden columns with a
    # tiny 0/1 matmul (avoids lane-crossing reshape/broadcast in-kernel).
    # Exact in f32: exactly one nonzero per column.
    gexp = jnp.dot(gate, expand_ref[...],
                   preferred_element_type=jnp.float32)            # (TM, EHp)

    hs = (h * gexp).astype(jnp.bfloat16)
    y = jnp.dot(hs, w2_ref[...], preferred_element_type=jnp.float32)   # (TM, Dp)
    # Gated second-layer biases: sum_e gate_e * b2_e.
    y = y + jnp.dot(gate, b2_ref[...], preferred_element_type=jnp.float32)

    out_ref[...] = y.astype(out_ref.dtype)


def _vmem_budget_bytes():
    # Physical VMEM per core: 64 MiB on v7x, 128 MiB on v5e/v6e.
    try:
        return int(pltpu.get_tpu_info().vmem_capacity_bytes * 3 // 4)
    except Exception:
        return 48 * 1024 * 1024   # conservative default (fits v7x)


def moe_layer_pallas(x, wg, bg, w1, b1, w2, b2, *, token_tile=256,
                     vmem_limit_bytes=None):
    """Pallas MoE forward.

    Args:
      x:  (B, S, D) activations.
      wg: (D, E) gate weight;  bg: (1, E) gate bias.
      w1: (E, D, H), b1: (E, 1, H): first expert Linear  (y = x @ W + b).
      w2: (E, H, D), b2: (E, 1, D): second expert Linear.
      token_tile: tokens per grid step (M dim of every matmul); 256-512
        amortizes per-step overhead, clamped by the VMEM budget below.
    Returns:
      (output (B, S, D), gate_scores (B, S, E)).
    """
    B, S, D = x.shape
    E = wg.shape[1]
    H = w1.shape[2]
    T = B * S
    EH = E * H

    Dp = _round_up(D, 128)
    Ep = _round_up(E, 128)
    EHp = _round_up(EH, 128)

    # ---- VMEM budget: resident fused weights + double-buffered token tiles --
    budget = _vmem_budget_bytes()
    weight_bytes = 2 * (Dp * Ep * 4 + Ep * 4 + Dp * EHp * 2 + EHp * 4
                        + Ep * EHp * 4 + EHp * Dp * 2 + Ep * Dp * 4)
    if weight_bytes > budget:
        # TODO(synk): add a grouped-expert streaming path (expert-group
        # reduction grid axis + f32 accumulator) for MoEs whose fused weights
        # do not fit VMEM (mainly relevant on v7x's 64 MiB).
        raise NotImplementedError(
            f"fused expert weights need ~{weight_bytes >> 20} MiB VMEM "
            f"(> budget {budget >> 20} MiB); grouped streaming not implemented")

    def tile_bytes(t):
        # double-buffered x/out/gate tiles + live f32 intermediates (h, gexp, hs)
        return 2 * (2 * t * Dp * 4 + t * Ep * 4) + 3 * t * EHp * 4

    tile = max(8, min(_round_up(token_tile, 8), _round_up(T, 8)))
    while tile > 64 and weight_bytes + tile_bytes(tile) > budget:
        tile = _round_up(max(64, tile // 2), 8)

    num_tiles = -(-T // tile)
    Tp = num_tiles * tile

    # ---- pad / fuse parameters (all lane dims -> multiples of 128) ----------
    x2 = x.reshape(T, D)
    if Tp != T or Dp != D:
        x2 = jnp.pad(x2, ((0, Tp - T), (0, Dp - D)))

    f32, bf16 = jnp.float32, jnp.bfloat16
    wg_p = jnp.zeros((Dp, Ep), f32).at[:D, :E].set(wg.astype(f32))
    bg_p = jnp.full((1, Ep), -1e30, f32).at[0, :E].set(bg.reshape(-1).astype(f32))

    # W1: (E, D, H) -> (D, E*H) with expert-major columns; bf16; padded.
    w1_all = jnp.transpose(w1, (1, 0, 2)).reshape(D, EH)
    w1_p = jnp.zeros((Dp, EHp), bf16).at[:D, :EH].set(w1_all.astype(bf16))
    b1_p = jnp.zeros((1, EHp), f32).at[0, :EH].set(b1.reshape(EH).astype(f32))

    # W2: (E, H, D) -> (E*H, D) stacked; bf16; padded.
    w2_p = jnp.zeros((EHp, Dp), bf16).at[:EH, :D].set(w2.reshape(EH, D).astype(bf16))
    # Stacked second-layer biases, applied in-kernel as gate @ B2.
    b2_p = jnp.zeros((Ep, Dp), f32).at[:E, :D].set(b2.reshape(E, D).astype(f32))

    # ExpandMat[e, c] = 1 iff column c belongs to expert e (c // H == e).
    col = jnp.arange(EHp)
    expand = ((jnp.arange(Ep)[:, None] == (col // H)[None, :])
              & (col < EH)[None, :]).astype(f32)

    cp_kwargs = dict(dimension_semantics=("parallel",))
    if vmem_limit_bytes is None and weight_bytes + tile_bytes(tile) > (28 << 20):
        vmem_limit_bytes = min(100 << 20,
                               int(1.25 * (weight_bytes + tile_bytes(tile))))
    if vmem_limit_bytes is not None:
        cp_kwargs["vmem_limit_bytes"] = int(vmem_limit_bytes)

    const = lambda i: (0, 0)   # constant block index -> fetched once, resident
    out, gate = pl.pallas_call(
        _moe_fused_kernel,
        out_shape=(
            jax.ShapeDtypeStruct((Tp, Dp), x.dtype),
            jax.ShapeDtypeStruct((Tp, Ep), jnp.float32),
        ),
        grid_spec=pltpu.PrefetchScalarGridSpec(
            num_scalar_prefetch=0,
            grid=(num_tiles,),
            in_specs=[
                pl.BlockSpec((tile, Dp), lambda i: (i, 0)),   # x token tile
                pl.BlockSpec((Dp, Ep), const),                # gate weight
                pl.BlockSpec((1, Ep), const),                 # gate bias (padded -1e30)
                pl.BlockSpec((Dp, EHp), const),               # fused W1 (bf16)
                pl.BlockSpec((1, EHp), const),                # fused b1
                pl.BlockSpec((Ep, EHp), const),               # gate expansion matrix
                pl.BlockSpec((EHp, Dp), const),               # stacked W2 (bf16)
                pl.BlockSpec((Ep, Dp), const),                # stacked b2
            ],
            out_specs=[
                pl.BlockSpec((tile, Dp), lambda i: (i, 0)),
                pl.BlockSpec((tile, Ep), lambda i: (i, 0)),
            ],
        ),
        compiler_params=pltpu.CompilerParams(**cp_kwargs),
    )(x2, wg_p, bg_p, w1_p, b1_p, expand, w2_p, b2_p)

    return (out[:T, :D].reshape(B, S, D),
            gate[:T, :E].reshape(B, S, E))


def moe_layer_reference(x, wg, bg, w1, b1, w2, b2):
    """Pure-JAX (f32) reference matching the PyTorch forward."""
    logits = jnp.einsum('bsd,de->bse', x, wg) + bg[0]
    gate = jax.nn.softmax(logits, axis=-1)                            # (B,S,E)
    h = jnp.maximum(jnp.einsum('bsd,edh->bseh', x, w1) + b1[:, 0], 0.0)
    y = jnp.einsum('bseh,ehd->bsed', h, w2) + b2[:, 0]                # (B,S,E,D)
    out = jnp.einsum('bsed,bse->bsd', y, gate)                        # (B,S,D)
    return out, gate


if __name__ == "__main__":
    batch, seq = 2, 64
    input_dim, hidden_dim, num_experts = 32, 64, 4

    key = jax.random.PRNGKey(0)
    kx, kx2, kg, kbg, k1, kb1, k2, kb2 = jax.random.split(key, 8)

    # Deterministic synthetic parameters (shapes follow the module's __init__).
    wg = jax.random.normal(kg, (input_dim, num_experts), jnp.float32) * 0.1
    bg = jax.random.normal(kbg, (1, num_experts), jnp.float32) * 0.1
    w1 = jax.random.normal(k1, (num_experts, input_dim, hidden_dim), jnp.float32) * 0.1
    b1 = jax.random.normal(kb1, (num_experts, 1, hidden_dim), jnp.float32) * 0.1
    w2 = jax.random.normal(k2, (num_experts, hidden_dim, input_dim), jnp.float32) * 0.1
    b2 = jax.random.normal(kb2, (num_experts, 1, input_dim), jnp.float32) * 0.1

    # Case 1: one full token tile (T = 128, default token_tile).
    x = jax.random.normal(kx, (batch, seq, input_dim), jnp.float32)
    out, gate = moe_layer_pallas(x, wg, bg, w1, b1, w2, b2)
    jax.block_until_ready((out, gate))
    ref_out, ref_gate = moe_layer_reference(x, wg, bg, w1, b1, w2, b2)
    # Gate is computed fully in f32 -> tight tolerance.
    assert jnp.allclose(gate, ref_gate, atol=1e-5, rtol=1e-5)
    # Expert matmuls use bf16 inputs (f32 accumulation) -> looser tolerance.
    assert jnp.allclose(out, ref_out, atol=2e-2, rtol=2e-2)

    # Case 2: multi-tile grid + ragged token count (exercises the padding path).
    x_b = jax.random.normal(kx2, (batch, 60, input_dim), jnp.float32)
    out_b, gate_b = moe_layer_pallas(x_b, wg, bg, w1, b1, w2, b2, token_tile=64)
    jax.block_until_ready((out_b, gate_b))
    ref_out_b, ref_gate_b = moe_layer_reference(x_b, wg, bg, w1, b1, w2, b2)
    assert jnp.allclose(gate_b, ref_gate_b, atol=1e-5, rtol=1e-5)
    assert jnp.allclose(out_b, ref_out_b, atol=2e-2, rtol=2e-2)

    print("KERNEL_OK")
</pallas_src>

<mosaic_0001>
module attributes {stable_mosaic.version = 11 : i64} {
  func.func @_moe_fused_kernel(%arg0: i32, %arg1: memref<128x128xf32, #tpu.memory_space<vmem>>, %arg2: memref<128x128xf32, #tpu.memory_space<vmem>>, %arg3: memref<1x128xf32, #tpu.memory_space<vmem>>, %arg4: memref<128x256xbf16, #tpu.memory_space<vmem>>, %arg5: memref<1x256xf32, #tpu.memory_space<vmem>>, %arg6: memref<128x256xf32, #tpu.memory_space<vmem>>, %arg7: memref<256x128xbf16, #tpu.memory_space<vmem>>, %arg8: memref<128x128xf32, #tpu.memory_space<vmem>>, %arg9: memref<128x128xf32, #tpu.memory_space<vmem>>, %arg10: memref<128x128xf32, #tpu.memory_space<vmem>>) attributes {dimension_semantics = [#tpu.dimension_semantics<parallel>], iteration_bounds = array<i64: 1>, scalar_prefetch = 0 : i64, scratch_operands = 0 : i64, tpu.core_type = #tpu.core_type<tc>, window_params = [{transform_indices = @transform_0, window_bounds = array<i64: 128, 128>}, {pipeline_mode = #tpu.pipeline_mode<synchronous>, transform_indices = @transform_1, window_bounds = array<i64: 128, 128>}, {pipeline_mode = #tpu.pipeline_mode<synchronous>, transform_indices = @transform_2, window_bounds = array<i64: 1, 128>}, {pipeline_mode = #tpu.pipeline_mode<synchronous>, transform_indices = @transform_3, window_bounds = array<i64: 128, 256>}, {pipeline_mode = #tpu.pipeline_mode<synchronous>, transform_indices = @transform_4, window_bounds = array<i64: 1, 256>}, {pipeline_mode = #tpu.pipeline_mode<synchronous>, transform_indices = @transform_5, window_bounds = array<i64: 128, 256>}, {pipeline_mode = #tpu.pipeline_mode<synchronous>, transform_indices = @transform_6, window_bounds = array<i64: 256, 128>}, {pipeline_mode = #tpu.pipeline_mode<synchronous>, transform_indices = @transform_7, window_bounds = array<i64: 128, 128>}, {transform_indices = @transform_8, window_bounds = array<i64: 128, 128>}, {transform_indices = @transform_9, window_bounds = array<i64: 128, 128>}]} {
    %c0 = arith.constant 0 : index
    %c0_0 = arith.constant 0 : index
    %0 = vector.load %arg1[%c0, %c0_0] : memref<128x128xf32, #tpu.memory_space<vmem>>, vector<128x128xf32>
    %c0_1 = arith.constant 0 : index
    %c0_2 = arith.constant 0 : index
    %1 = vector.load %arg2[%c0_1, %c0_2] : memref<128x128xf32, #tpu.memory_space<vmem>>, vector<128x128xf32>
    %cst = arith.constant dense<0.000000e+00> : vector<128x128xf32>
    %2 = tpu.matmul %0, %1, %cst {dimension_numbers = #tpu.dot_dimension_numbers<[1], [0], [0], [1], [0, 0, 1, 1], [], []>} : vector<128x128xf32>, vector<128x128xf32>, vector<128x128xf32> -> vector<128x128xf32>
    %c0_3 = arith.constant 0 : index
    %c0_4 = arith.constant 0 : index
    %3 = vector.load %arg3[%c0_3, %c0_4] : memref<1x128xf32, #tpu.memory_space<vmem>>, vector<1x128xf32>
    %4 = vector.broadcast %3 : vector<1x128xf32> to vector<128x128xf32>
    %5 = arith.addf %2, %4 : vector<128x128xf32>
    %cst_5 = arith.constant dense<0xFF800000> : vector<128xf32>
    %6 = vector.multi_reduction <maximumf>, %5, %cst_5 [1] : vector<128x128xf32> to vector<128xf32>
    %7 = vector.shape_cast %6 : vector<128xf32> to vector<128x1xf32>
    %8 = vector.broadcast %7 : vector<128x1xf32> to vector<128x128xf32>
    %9 = arith.subf %5, %8 : vector<128x128xf32>
    %10 = math.exp %9 : vector<128x128xf32>
    %cst_6 = arith.constant dense<0.000000e+00> : vector<128xf32>
    %11 = vector.multi_reduction <add>, %10, %cst_6 [1] : vector<128x128xf32> to vector<128xf32>
    %12 = vector.shape_cast %11 : vector<128xf32> to vector<128x1xf32>
    %13 = tpu.reciprocal %12 : vector<128x1xf32> -> vector<128x1xf32>
    %14 = vector.broadcast %13 : vector<128x1xf32> to vector<128x128xf32>
    %15 = arith.mulf %10, %14 : vector<128x128xf32>
    %c0_7 = arith.constant 0 : index
    %c0_8 = arith.constant 0 : index
    %16 = vector.load %arg10[%c0_7, %c0_8] : memref<128x128xf32, #tpu.memory_space<vmem>>, vector<128x128xf32>
    tpu.vector_store %arg10[%c0_7, %c0_8], %15 {strides = array<i32>} : memref<128x128xf32, #tpu.memory_space<vmem>>, vector<128x128xf32>,
    %17 = arith.truncf %0 : vector<128x128xf32> to vector<128x128xbf16>
    %c0_9 = arith.constant 0 : index
    %c0_10 = arith.constant 0 : index
    %18 = vector.load %arg4[%c0_9, %c0_10] : memref<128x256xbf16, #tpu.memory_space<vmem>>, vector<128x256xbf16>
    %cst_11 = arith.constant dense<0.000000e+00> : vector<128x256xf32>
    %19 = tpu.matmul %17, %18, %cst_11 {dimension_numbers = #tpu.dot_dimension_numbers<[1], [0], [0], [1], [0, 0, 1, 1], [], []>} : vector<128x128xbf16>, vector<128x256xbf16>, vector<128x256xf32> -> vector<128x256xf32>
    %c0_12 = arith.constant 0 : index
    %c0_13 = arith.constant 0 : index
    %20 = vector.load %arg5[%c0_12, %c0_13] : memref<1x256xf32, #tpu.memory_space<vmem>>, vector<1x256xf32>
    %21 = vector.broadcast %20 : vector<1x256xf32> to vector<128x256xf32>
    %22 = arith.addf %19, %21 : vector<128x256xf32>
    %cst_14 = arith.constant 0.000000e+00 : f32
    %23 = vector.broadcast %cst_14 : f32 to vector<128x256xf32>
    %24 = arith.maximumf %22, %23 : vector<128x256xf32>
    %c0_15 = arith.constant 0 : index
    %c0_16 = arith.constant 0 : index
    %25 = vector.load %arg6[%c0_15, %c0_16] : memref<128x256xf32, #tpu.memory_space<vmem>>, vector<128x256xf32>
    %cst_17 = arith.constant dense<0.000000e+00> : vector<128x256xf32>
    %26 = tpu.matmul %15, %25, %cst_17 {dimension_numbers = #tpu.dot_dimension_numbers<[1], [0], [0], [1], [0, 0, 1, 1], [], []>} : vector<128x128xf32>, vector<128x256xf32>, vector<128x256xf32> -> vector<128x256xf32>
    %27 = arith.mulf %24, %26 : vector<128x256xf32>
    %28 = arith.truncf %27 : vector<128x256xf32> to vector<128x256xbf16>
    %c0_18 = arith.constant 0 : index
    %c0_19 = arith.constant 0 : index
    %29 = vector.load %arg7[%c0_18, %c0_19] : memref<256x128xbf16, #tpu.memory_space<vmem>>, vector<256x128xbf16>
    %cst_20 = arith.constant dense<0.000000e+00> : vector<128x128xf32>
    %30 = tpu.matmul %28, %29, %cst_20 {dimension_numbers = #tpu.dot_dimension_numbers<[1], [0], [0], [1], [0, 0, 1, 1], [], []>} : vector<128x256xbf16>, vector<256x128xbf16>, vector<128x128xf32> -> vector<128x128xf32>
    %c0_21 = arith.constant 0 : index
    %c0_22 = arith.constant 0 : index
    %31 = vector.load %arg8[%c0_21, %c0_22] : memref<128x128xf32, #tpu.memory_space<vmem>>, vector<128x128xf32>
    %cst_23 = arith.constant dense<0.000000e+00> : vector<128x128xf32>
    %32 = tpu.matmul %15, %31, %cst_23 {dimension_numbers = #tpu.dot_dimension_numbers<[1], [0], [0], [1], [0, 0, 1, 1], [], []>} : vector<128x128xf32>, vector<128x128xf32>, vector<128x128xf32> -> vector<128x128xf32>
    %33 = arith.addf %30, %32 : vector<128x128xf32>
    %c0_24 = arith.constant 0 : index
    %c0_25 = arith.constant 0 : index
    %34 = vector.load %arg9[%c0_24, %c0_25] : memref<128x128xf32, #tpu.memory_space<vmem>>, vector<128x128xf32>
    tpu.vector_store %arg9[%c0_24, %c0_25], %33 {strides = array<i32>} : memref<128x128xf32, #tpu.memory_space<vmem>>, vector<128x128xf32>,
    return
  }
  func.func @transform_0(%arg0: i32) -> (i32, i32) {
    %c0_i32 = arith.constant 0 : i32
    %c0_i32_0 = arith.constant 0 : i32
    return %arg0, %c0_i32 : i32, i32
  }
  func.func @transform_1(%arg0: i32) -> (i32, i32) {
    %c0_i32 = arith.constant 0 : i32
    %c0_i32_0 = arith.constant 0 : i32
    %c0_i32_1 = arith.constant 0 : i32
    return %c0_i32, %c0_i32_0 : i32, i32
  }
  func.func @transform_2(%arg0: i32) -> (i32, i32) {
    %c0_i32 = arith.constant 0 : i32
    %c0_i32_0 = arith.constant 0 : i32
    %c0_i32_1 = arith.constant 0 : i32
    return %c0_i32, %c0_i32_0 : i32, i32
  }
  func.func @transform_3(%arg0: i32) -> (i32, i32) {
    %c0_i32 = arith.constant 0 : i32
    %c0_i32_0 = arith.constant 0 : i32
    %c0_i32_1 = arith.constant 0 : i32
    return %c0_i32, %c0_i32_0 : i32, i32
  }
  func.func @transform_4(%arg0: i32) -> (i32, i32) {
    %c0_i32 = arith.constant 0 : i32
    %c0_i32_0 = arith.constant 0 : i32
    %c0_i32_1 = arith.constant 0 : i32
    return %c0_i32, %c0_i32_0 : i32, i32
  }
  func.func @transform_5(%arg0: i32) -> (i32, i32) {
    %c0_i32 = arith.constant 0 : i32
    %c0_i32_0 = arith.constant 0 : i32
    %c0_i32_1 = arith.constant 0 : i32
    return %c0_i32, %c0_i32_0 : i32, i32
  }
  func.func @transform_6(%arg0: i32) -> (i32, i32) {
    %c0_i32 = arith.constant 0 : i32
    %c0_i32_0 = arith.constant 0 : i32
    %c0_i32_1 = arith.constant 0 : i32
    return %c0_i32, %c0_i32_0 : i32, i32
  }
  func.func @transform_7(%arg0: i32) -> (i32, i32) {
    %c0_i32 = arith.constant 0 : i32
    %c0_i32_0 = arith.constant 0 : i32
    %c0_i32_1 = arith.constant 0 : i32
    return %c0_i32, %c0_i32_0 : i32, i32
  }
  func.func @transform_8(%arg0: i32) -> (i32, i32) {
    %c0_i32 = arith.constant 0 : i32
    %c0_i32_0 = arith.constant 0 : i32
    return %arg0, %c0_i32 : i32, i32
  }
  func.func @transform_9(%arg0: i32) -> (i32, i32) {
    %c0_i32 = arith.constant 0 : i32
    %c0_i32_0 = arith.constant 0 : i32
    return %arg0, %c0_i32 : i32, i32
  }
}

</mosaic_0001>

<bundles_post_ra>
// kernel: tpu_custom_call.1
= control target key start
LH: loop header
LB: loop body
LE: loop exit
PB: predicated region body
PF: predicated region fallthrough
CT: control target
= control target key end

     0   :  { %15 = vsyncpa [#allocation3], 0  ;;  %s2276_s0 = inlined_call_operand.hbm [shape: f32[128,128], index: 0, kind: input, shape index: {}]   ;;  %s2277_s1 = inlined_call_operand.hbm [shape: f32[128,128], index: 1, kind: input, shape index: {}]   ;;  %s2278_s2 = inlined_call_operand.vmem [shape: f32[1,128], index: 2, kind: input, shape index: {}]   ;;  %s2279_s3 = inlined_call_operand.hbm [shape: bf16[128,256], index: 3, kind: input, shape index: {}]   ;;  %s2280_s4 = inlined_call_operand.vmem [shape: f32[1,256], index: 4, kind: input, shape index: {}]   ;;  %s2281_s5 = inlined_call_operand.hbm [shape: f32[128,256], index: 5, kind: input, shape index: {}]   ;;  %s2282_s6 = inlined_call_operand.hbm [shape: bf16[256,128], index: 6, kind: input, shape index: {}]   ;;  %s2283_s7 = inlined_call_operand.hbm [shape: f32[128,128], index: 7, kind: input, shape index: {}]   ;;  %s2284_s8 = inlined_call_operand.hbm [shape: f32[128,128], index: 8, kind: output, shape index: {0}]   ;;  %s2285_s9 = inlined_call_operand.hbm [shape: f32[128,128], index: 9, kind: output, shape index: {1}]  }
   0x1   :  { %16 = vsyncpa [#allocation6], 0 }
   0x2   :  { %17 = vsyncpa [#allocation9], 0 }
   0x3   :  { %18 = vsyncpa [#allocation12], 0 }
   0x4   :  { %19 = vsyncpa [#allocation4], 0 }
   0x5   :  { %20 = vsyncpa [#allocation15], 0  ;;  %s38_s11 = sshll.u32 %s2277_s1, 4  ;;  %s1852_s12 = smov [#allocation5]   ;;  %s39_s11 = int_to_ptr.hbm [resolvable:$true] %s38_s11 }
   0x6   :  { %s40_s13 = sshll.u32 %s1852_s12, 4  ;;  %s68_s16 = sshll.u32 %s2281_s5, 4  ;;  %s41_s13 = int_to_ptr.vmem [resolvable:$true] %s40_s13  ;;  %s69_s16 = int_to_ptr.hbm [resolvable:$true] %s68_s16 }
   0x7   :  { %s1853_s17 = smov 128   ;;  %s1854_s18 = smov 8  }
   0x8   :  { %46 = dma.hbm_to_vmem [thread:$0]  %s39_s11, 2048, %s41_s13, [#allocation6], %s1853_s17, %s1853_s17, %s1854_s18  }
   0x9   :  { %s1855_s19 = smov [#allocation8]   ;;  %s1856_s21 = smov 256  }
   0xa   :  { %s70_s20 = sshll.u32 %s1855_s19, 4  ;;  %s1857_s1 = smov 16   ;;  %s71_s20 = int_to_ptr.vmem [resolvable:$true] %s70_s20 }
   0xb   :  { %76 = dma.hbm_to_vmem [thread:$0]  %s69_s16, 4096, %s71_s20, [#allocation9], %s1856_s21, %s1856_s21, %s1857_s1  }
   0xc   :  { %s25_s24 = sshll.u32 %s2276_s0, 4  ;;  %s1858_s25 = smov [#allocation2]   ;;  %s26_s24 = int_to_ptr.hbm [resolvable:$true] %s25_s24 }
   0xd   :  { %s27_s5 = sshll.u32 %s1858_s25, 4  ;;  %s53_s28 = sshll.u32 %s2279_s3, 4  ;;  %s28_s5 = int_to_ptr.vmem [resolvable:$true] %s27_s5  ;;  %s54_s28 = int_to_ptr.hbm [resolvable:$true] %s53_s28 }
   0xe   :  { %33 = dma.hbm_to_vmem [thread:$0]  %s26_s24, 2048, %s28_s5, [#allocation3], %s1853_s17, %s1853_s17, %s1854_s18  }
   0xf   :  { %s1859_s29 = smov [#allocation7]   ;;  %s81_s12 = sshll.u32 %s2282_s6, 4  ;;  %s82_s12 = int_to_ptr.hbm [resolvable:$true] %s81_s12 }
  0x10   :  { %s55_s30 = sshll.u32 %s1859_s29, 4  ;;  %s1860_s0 = smov [#allocation10]   ;;  %s56_s30 = int_to_ptr.vmem [resolvable:$true] %s55_s30 }
  0x11   :  { %61 = dma.hbm_to_vmem [thread:$0]  %s54_s28, 2048, %s56_s30, [#allocation6], %s1853_s17, %s1853_s17, %s1854_s18  }
  0x12   :  { %s83_s13 = sshll.u32 %s1860_s0, 4  ;;  %s94_s15 = sshll.u32 %s2283_s7, 4  ;;  %s84_s13 = int_to_ptr.vmem [resolvable:$true] %s83_s13  ;;  %s95_s15 = int_to_ptr.hbm [resolvable:$true] %s94_s15 }
  0x13   :  { %s1861_s16 = smov 64   ;;  %s1862_s19 = smov 4  }
  0x14   :  { %89 = dma.hbm_to_vmem [thread:$0]  %s82_s12, 2048, %s84_s13, [#allocation9], %s1861_s16, %s1861_s16, %s1862_s19  }
  0x15   :  { %s1863_s20 = smov [#allocation11]  }
  0x16   :  { %s96_s21 = sshll.u32 %s1863_s20, 4  ;;  %s97_s21 = int_to_ptr.vmem [resolvable:$true] %s96_s21 }
  0x17   :  { %102 = dma.hbm_to_vmem [thread:$0]  %s95_s15, 2048, %s97_s21, [#allocation12], %s1853_s17, %s1853_s17, %s1854_s18  }
  0x18   :  { %1840 = dma.done.wait [#allocation3], 2048  }
  0x19   :  { %1841 = vsyncadd [#allocation3], 4294965248 }
  0x1a   :  { %1842 = dma.done.wait [#allocation6], 4096  }
  0x1b   :  { %1843 = vsyncadd [#allocation6], 4294963200 }
  0x1c   :  { %1844 = dma.done.wait [#allocation9], 6144  }
  0x1d   :  { %1845 = vsyncadd [#allocation9], 4294961152 }
  0x1e   :  { %1846 = dma.done.wait [#allocation12], 2048  }
  0x1f   :  { %1847 = vsyncadd [#allocation12], 4294965248  ;;  %v158_v0 = vld [vmem:[#allocation5 + $0x78] sm:$0xff]  ;;  %v157_v1 = vld [vmem:[#allocation5 + $0x70] sm:$0xff]  ;;  %s1388_s25 = sshll.u32 %s2285_s9, 4  ;;  %s1865_s9 = smov [#allocation13]   ;;  %s1389_s25 = int_to_ptr.hbm [resolvable:$true] %s1388_s25 }
  0x20   :  { %163 = vmatpush.msra.mxu0 %v158_v0  ;;  %v156_v2 = vld [vmem:[#allocation5 + $0x68] sm:$0xff]  ;;  %v155_v3 = vld [vmem:[#allocation5 + $0x60] sm:$0xff]  ;;  %v154_v4 = vld [vmem:[#allocation5 + $0x58] sm:$0xff]  ;;  %s1373_s5 = sshll.u32 %s1865_s9, 4  ;;  %s1375_s28 = sshll.u32 %s2284_s8, 4  ;;  %s1374_s5 = int_to_ptr.vmem [resolvable:$true] %s1373_s5  ;;  %s1376_s28 = int_to_ptr.hbm [resolvable:$true] %s1375_s28 }
  0x21   :  { %v153_v5 = vld [vmem:[#allocation5 + $0x50] sm:$0xff]  ;;  %v152_v6 = vld [vmem:[#allocation5 + $0x48] sm:$0xff]  ;;  %v151_v7 = vld [vmem:[#allocation5 + $0x40] sm:$0xff] }
  0x22   :  { %164 = vmatpush.msra.mxu0 %v157_v1  ;;  %v150_v8 = vld [vmem:[#allocation5 + $0x38] sm:$0xff]  ;;  %v149_v9 = vld [vmem:[#allocation5 + $0x30] sm:$0xff]  ;;  %v148_v10 = vld [vmem:[#allocation5 + $0x28] sm:$0xff] }
  0x23   :  { %v147_v11 = vld [vmem:[#allocation5 + $0x20] sm:$0xff]  ;;  %v146_v12 = vld [vmem:[#allocation5 + $0x18] sm:$0xff]  ;;  %v145_v13 = vld [vmem:[#allocation5 + $0x10] sm:$0xff] }
  0x24   :  { %165 = vmatpush.msra.mxu0 %v156_v2  ;;  %v144_v14 = vld [vmem:[#allocation5 + $0x8] sm:$0xff]  ;;  %v143_v15 = vld [vmem:[#allocation5] sm:$0xff]  ;;  %v1952_v18 = vld [vmem:[#allocation2 + $0x10] sm:$0xff] }
  0x25   :  { %v1946_v16 = vld [vmem:[#allocation2] sm:$0xff]  ;;  %v1949_v17 = vld [vmem:[#allocation2 + $0x8] sm:$0xff]  ;;  %v1955_v19 = vld [vmem:[#allocation2 + $0x18] sm:$0xff] }
  0x26   :  { %166 = vmatpush.msra.mxu0 %v155_v3  ;;  %v1958_v20 = vld [vmem:[#allocation2 + $0x20] sm:$0xff]  ;;  %v1961_v21 = vld [vmem:[#allocation2 + $0x28] sm:$0xff]  ;;  %v1964_v22 = vld [vmem:[#allocation2 + $0x30] sm:$0xff] }
  0x27   :  { %v1967_v23 = vld [vmem:[#allocation2 + $0x38] sm:$0xff]  ;;  %v1970_v24 = vld [vmem:[#allocation2 + $0x40] sm:$0xff]  ;;  %v1973_v25 = vld [vmem:[#allocation2 + $0x48] sm:$0xff] }
  0x28   :  { %167 = vmatpush.msra.mxu0 %v154_v4  ;;  %v1976_v26 = vld [vmem:[#allocation2 + $0x50] sm:$0xff]  ;;  %v1982_v27 = vld [vmem:[%s2278_s2] ss:$0 sm:$0xff]  ;;  %v1984_v29 = vld [vmem:[#allocation2 + $0x58] sm:$0xff] }
  0x29   :  { %v1991_v32 = vld [vmem:[#allocation2 + $0x60] sm:$0xff]  ;;  %v1998_v35 = vld [vmem:[#allocation2 + $0x68] sm:$0xff]  ;;  %v2005_v38 = vld [vmem:[#allocation2 + $0x70] sm:$0xff] }
  0x2a   :  { %168 = vmatpush.msra.mxu0 %v153_v5  ;;  %v1467_v40 = vld [vmem:[#allocation7 + $0x70] sm:$0xf]  ;;  %v1552_v41 = vld [vmem:[#allocation7 + $0x74] sm:$0xf0]  ;;  %v1459_v43 = vld [vmem:[#allocation7 + $0x60] sm:$0xf] }
  0x2b   :  { %v1468_v42 = vor.u32 %v1552_v41, %v1467_v40  ;;  %v1550_v44 = vld [vmem:[#allocation7 + $0x64] sm:$0xf0]  ;;  %v2012_v45 = vld [vmem:[#allocation2 + $0x78] sm:$0xff]  ;;  %v1451_v47 = vld [vmem:[#allocation7 + $0x50] sm:$0xf] }
  0x2c   :  { %169 = vmatpush.msra.mxu0 %v152_v6  ;;  %v1460_v46 = vor.u32 %v1550_v44, %v1459_v43  ;;  %v1548_v48 = vld [vmem:[#allocation7 + $0x54] sm:$0xf0]  ;;  %v1443_v52 = vld [vmem:[#allocation7 + $0x40] sm:$0xf]  ;;  %v1546_v53 = vld [vmem:[#allocation7 + $0x44] sm:$0xf0]  ;;  %v2069_v44 = vpack.c.bf16 %v1967_v23, %v1964_v22 }
  0x2d   :  { %706 = vmatpush.bf16.msra.mxu1 %v1468_v42  ;;  %v1452_v51 = vor.u32 %v1548_v48, %v1451_v47  ;;  %v1444_v54 = vor.u32 %v1546_v53, %v1443_v52  ;;  %v1435_v61 = vld [vmem:[#allocation7 + $0x30] sm:$0xf]  ;;  %v1544_v62 = vld [vmem:[#allocation7 + $0x34] sm:$0xf0]  ;;  %v1427_v0 = vld [vmem:[#allocation7 + $0x20] sm:$0xf] }
  0x2e   :  { %170 = vmatpush.msra.mxu0 %v151_v7  ;;  %v1436_v63 = vor.u32 %v1544_v62, %v1435_v61  ;;  %v1542_v1 = vld [vmem:[#allocation7 + $0x24] sm:$0xf0]  ;;  %v1419_v3 = vld [vmem:[#allocation7 + $0x10] sm:$0xf]  ;;  %v1540_v4 = vld [vmem:[#allocation7 + $0x14] sm:$0xf0] }
  0x2f   :  { %v1428_v2 = vor.u32 %v1542_v1, %v1427_v0  ;;  %v1420_v5 = vor.u32 %v1540_v4, %v1419_v3  ;;  %v1411_v6 = vld [vmem:[#allocation7] sm:$0xf]  ;;  %v1538_v7 = vld [vmem:[#allocation7 + $0x4] sm:$0xf0]  ;;  %v1549_v62 = vld [vmem:[#allocation7 + $0x64] sm:$0xf] }
  0x30   :  { %171 = vmatpush.msra.mxu0 %v150_v8  ;;  %v1412_v8 = vor.u32 %v1538_v7, %v1411_v6  ;;  %v865_v61 = vld [vmem:[#allocation8 + $0xe8] sm:$0xff]  ;;  %v863_v0 = vld [vmem:[#allocation8 + $0xd8] sm:$0xff]  ;;  %v1547_v4 = vld [vmem:[#allocation7 + $0x54] sm:$0xf] }
  0x31   :  { %707 = vmatpush.bf16.msra.mxu1 %v1460_v46 }
  0x32   :  { %172 = vmatpush.msra.mxu0 %v149_v9  ;;  %v2033_v9 = vpack.c.bf16 %v1949_v17, %v1946_v16 }
  0x34   :  { %173 = vmatpush.msra.mxu0 %v148_v10 }
  0x35   :  { %708 = vmatpush.bf16.msra.mxu1 %v1452_v51 }
  0x36   :  { %174 = vmatpush.msra.mxu0 %v147_v11 }
  0x38   :  { %175 = vmatpush.msra.mxu0 %v146_v12 }
  0x39   :  { %709 = vmatpush.bf16.msra.mxu1 %v1444_v54  ;;  %v867_v54 = vld [vmem:[#allocation8 + $0xf8] sm:$0xff] }
  0x3a   :  { %176 = vmatpush.msra.mxu0 %v145_v13  ;;  %v2039_v13 = vpack.c.bf16 %v1955_v19, %v1952_v18 }
  0x3c   :  { %177 = vmatpush.msra.mxu0 %v144_v14 }
  0x3d   :  { %710 = vmatpush.bf16.msra.mxu1 %v1436_v63  ;;  %v1461_v63 = vld [vmem:[#allocation7 + $0x68] sm:$0xf0] }
  0x3e   :  { %178 = vmatpush.msra.mxu0 %v143_v15  ;;  %v1464_v1 = vor.u32 %v1549_v62, %v1461_v63 }
  0x3f   :  { %179 = vmatmul.f32.vlgmr.msra.gmra.mxu0 %v1946_v16 }
  0x40   :  { %933 = vmatpush.msrb.mxu0 %v867_v54  ;;  %v1089_v54 = vld [vmem:[#allocation11 + $0x58] sm:$0xff] }
  0x41   :  { %711 = vmatpush.bf16.msra.mxu1 %v1428_v2 }
  0x42   :  { %934 = vmatpush.msrb.mxu0 %v865_v61  ;;  %v2111_v61 = vpack.c.bf16 %v1984_v29, %v1976_v26 }
  0x44   :  { %935 = vmatpush.msrb.mxu0 %v863_v0 }
  0x45   :  { %712 = vmatpush.bf16.msra.mxu1 %v1420_v5  ;;  %v1453_v5 = vld [vmem:[#allocation7 + $0x58] sm:$0xf0] }
  0x47   :  { %182 = vmatmul.f32.gmra.mxu0 %v1949_v17 }
  0x49   :  { %713 = vmatpush.bf16.msra.mxu1 %v1412_v8 }
  0x4c   :  { %714 = vmatmul.bf16.vlgmr.msra.gmra.mxu1 %v2033_v9 }
  0x4f   :  { %185 = vmatmul.f32.gmra.mxu0 %v1952_v18 }
  0x57   :  { %188 = vmatmul.f32.gmra.mxu0 %v1955_v19  ;;  %v2052_v19 = vpack.c.bf16 %v1961_v21, %v1958_v20 }
  0x5c   :  { %719 = vmatmul.bf16.gmra.mxu1 %v2039_v13 }
  0x5f   :  { %191 = vmatmul.f32.gmra.mxu0 %v1958_v20 }
  0x67   :  { %194 = vmatmul.f32.gmra.mxu0 %v1961_v21 }
  0x6c   :  { %724 = vmatmul.bf16.gmra.mxu1 %v2052_v19 }
  0x6f   :  { %197 = vmatmul.f32.gmra.mxu0 %v1964_v22 }
  0x77   :  { %200 = vmatmul.f32.gmra.mxu0 %v1967_v23 }
  0x7c   :  { %729 = vmatmul.bf16.gmra.mxu1 %v2069_v44 }
  0x7f   :  { %203 = vmatmul.f32.gmra.mxu0 %v1970_v24 }
  0x87   :  { %206 = vmatmul.f32.gmra.mxu0 %v1973_v25 }
  0x8f   :  { %209 = vmatmul.f32.gmra.mxu0 %v1976_v26 }
  0x97   :  { %212 = vmatmul.f32.gmra.mxu0 %v1984_v29  ;;  %v2127_v29 = vpack.c.bf16 %v1998_v35, %v1991_v32 }
  0x9f   :  { %215 = vmatmul.f32.gmra.mxu0 %v1991_v32  ;;  %v850_v32 = vld [vmem:[#allocation8 + $0x70] sm:$0xff] }
  0xa7   :  { %218 = vmatmul.f32.gmra.mxu0 %v1998_v35  ;;  %v851_v35 = vld [vmem:[#allocation8 + $0x78] sm:$0xff] }
  0xaf   :  { %221 = vmatmul.f32.gmra.mxu0 %v2005_v38 }
  0xb7   :  { %224 = vmatmul.f32.gmra.mxu0 %v2012_v45 }
  0xbc   :  { %v180_v28 = vpop.f32.mrf.mxu0 }
  0xbd   :  { %v1987_v30 = vadd.f32 %v1982_v27, %v180_v28 }
  0xbf   :  { %228 = vmax.xlane.f32.xlu0 %v1987_v30 }
  0xc4   :  { %v183_v31 = vpop.f32.mrf.mxu0 }
  0xc5   :  { %v1994_v33 = vadd.f32 %v1982_v27, %v183_v31 }
  0xc7   :  { %230 = vmax.xlane.f32.xlu0 %v1994_v33 }
  0xcc   :  { %v186_v34 = vpop.f32.mrf.mxu0 }
  0xcd   :  { %v2001_v36 = vadd.f32 %v1982_v27, %v186_v34 }
  0xcf   :  { %232 = vmax.xlane.f32.xlu1 %v2001_v36 }
  0xd4   :  { %v189_v37 = vpop.f32.mrf.mxu0 }
  0xd5   :  { %v2008_v39 = vadd.f32 %v1982_v27, %v189_v37 }
  0xd7   :  { %234 = vmax.xlane.f32.xlu1 %v2008_v39 }
  0xdc   :  { %v192_v49 = vpop.f32.mrf.mxu0 }
  0xdd   :  { %v2015_v50 = vadd.f32 %v1982_v27, %v192_v49 }
  0xdf   :  { %236 = vmax.xlane.f32.xlu2 %v2015_v50 }
  0xe4   :  { %v195_v55 = vpop.f32.mrf.mxu0 }
  0xe5   :  { %v2020_v56 = vadd.f32 %v1982_v27, %v195_v55  ;;  %v1551_v55 = vld [vmem:[#allocation7 + $0x74] sm:$0xf] }
  0xe7   :  { %238 = vmax.xlane.f32.xlu2 %v2020_v56 }
  0xec   :  { %v198_v57 = vpop.f32.mrf.mxu0 }
  0xed   :  { %v2024_v58 = vadd.f32 %v1982_v27, %v198_v57  ;;  %v1469_v57 = vld [vmem:[#allocation7 + $0x78] sm:$0xf0] }
  0xef   :  { %240 = vmax.xlane.f32.xlu0 %v2024_v58 }
  0xf4   :  { %v201_v59 = vpop.f32.mrf.mxu0 }
  0xf5   :  { %v2028_v60 = vadd.f32 %v1982_v27, %v201_v59  ;;  %v1472_v59 = vor.u32 %v1551_v55, %v1469_v57  ;;  %v1541_v55 = vld [vmem:[#allocation7 + $0x24] sm:$0xf] }
  0xf6   :  { %v856_v57 = vld [vmem:[#allocation8 + $0xa0] sm:$0xff] }
  0xf7   :  { %242 = vmax.xlane.f32.xlu2 %v2028_v60  ;;  %755 = vmatpush.bf16.msra.mxu2 %v1472_v59  ;;  %v1088_v59 = vld [vmem:[#allocation11 + $0x50] sm:$0xff] }
  0xfb   :  { %756 = vmatpush.bf16.msra.mxu2 %v1464_v1 }
  0xfc   :  { %v204_v10 = vpop.f32.mrf.mxu0 }
 0x104   :  { %v207_v31 = vpop.f32.mrf.mxu0 }
 0x105   :  { %v2060_v42 = vadd.f32 %v1982_v27, %v207_v31  ;;  %v861_v31 = vld [vmem:[#allocation8 + $0xc8] sm:$0xff] }
 0x106   :  { %936 = vmatpush.msrb.mxu0 %v861_v31  ;;  %v849_v31 = vld [vmem:[#allocation8 + $0x68] sm:$0xff] }
 0x10c   :  { %v210_v40 = vpop.f32.mrf.mxu0 }
 0x10d   :  { %v2072_v47 = vadd.f32 %v1982_v27, %v210_v40 }
 0x114   :  { %v213_v21 = vpop.f32.mrf.mxu0 }
 0x115   :  { %v2081_v22 = vadd.f32 %v1982_v27, %v213_v21 }
 0x11c   :  { %v216_v51 = vpop.f32.mrf.mxu0 }
 0x11d   :  { %v2093_v3 = vadd.f32 %v1982_v27, %v216_v51 }
 0x124   :  { %v219_v7 = vpop.f32.mrf.mxu0 }
 0x125   :  { %v2102_v40 = vadd.f32 %v1982_v27, %v219_v7  ;;  %v1421_v7 = vld [vmem:[#allocation7 + $0x18] sm:$0xf0] }
 0x132   :  { %v229_v11 = vpop.xlane.xlu0 %228 }
 0x133   :  { %v260_v12 = vsub.f32 %v1987_v30, %v229_v11  ;;  %v2047_v30 = vadd.f32 %v1982_v27, %v204_v10  ;;  %v1093_v11 = vld [vmem:[#allocation11 + $0x78] sm:$0xff] }
 0x134   :  { %1094 = vmatpush.msrb.mxu1 %v1093_v11  ;;  %v2132_v11 = vpack.c.bf16 %v2012_v45, %v2005_v38  ;;  %v846_v38 = vld [vmem:[#allocation8 + $0x50] sm:$0xff]  ;;  %v847_v45 = vld [vmem:[#allocation8 + $0x58] sm:$0xff] }
 0x135   :  { %v276_v14 = vmul.f32 1.442695, %v260_v12  ;;  %v1545_v12 = vld [vmem:[#allocation7 + $0x44] sm:$0xf] }
 0x137   :  { %1584 = vpow2.f32 %v276_v14  ;;  %v1445_v14 = vld [vmem:[#allocation7 + $0x48] sm:$0xf0] }
 0x13a   :  { %v231_v15 = vpop.xlane.xlu0 %230 }
 0x13b   :  { %v261_v28 = vsub.f32 %v1994_v33, %v231_v15  ;;  %v864_v15 = vld [vmem:[#allocation8 + $0xe0] sm:$0xff] }
 0x13d   :  { %v2043_v16 = vpop.eup %1584  ;;  %v278_v17 = vmul.f32 1.442695, %v261_v28  ;;  %v862_v28 = vld [vmem:[#allocation8 + $0xd0] sm:$0xff] }
 0x13e   :  { %308 = vadd.xlane.f32.xlu1 %v2043_v16 }
 0x13f   :  { %1586 = vpow2.f32 %v278_v17  ;;  %v1448_v17 = vor.u32 %v1545_v12, %v1445_v14  ;;  %v1085_v12 = vld [vmem:[#allocation11 + $0x38] sm:$0xff]  ;;  %v1537_v14 = vld [vmem:[#allocation7 + $0x4] sm:$0xf] }
 0x142   :  { %v233_v34 = vpop.xlane.xlu1 %232 }
 0x143   :  { %v262_v18 = vsub.f32 %v2001_v36, %v233_v34  ;;  %v1091_v34 = vld [vmem:[#allocation11 + $0x68] sm:$0xff] }
 0x145   :  { %v2054_v37 = vpop.eup %1586  ;;  %v280_v33 = vmul.f32 1.442695, %v262_v18  ;;  %v859_v18 = vld [vmem:[#allocation8 + $0xb8] sm:$0xff] }
 0x146   :  { %244 = vmax.xlane.f32.xlu1 %v2047_v30  ;;  %310 = vadd.xlane.f32.xlu0 %v2054_v37 }
 0x147   :  { %1588 = vpow2.f32 %v280_v33  ;;  %937 = vmatpush.msrb.mxu0 %v859_v18  ;;  %v844_v18 = vld [vmem:[#allocation8 + $0x40] sm:$0xff] }
 0x14a   :  { %v235_v41 = vpop.xlane.xlu1 %234 }
 0x14b   :  { %v263_v36 = vsub.f32 %v2008_v39, %v235_v41  ;;  %v1543_v41 = vld [vmem:[#allocation7 + $0x34] sm:$0xf] }
 0x14d   :  { %v2063_v43 = vpop.eup %1588  ;;  %v282_v20 = vmul.f32 1.442695, %v263_v36  ;;  %v1437_v36 = vld [vmem:[#allocation7 + $0x38] sm:$0xf0] }
 0x14e   :  { %312 = vadd.xlane.f32.xlu2 %v2063_v43  ;;  %246 = vmax.xlane.f32.xlu0 %v2060_v42 }
 0x14f   :  { %1590 = vpow2.f32 %v282_v20  ;;  %v860_v20 = vld [vmem:[#allocation8 + $0xc0] sm:$0xff] }
 0x152   :  { %v237_v46 = vpop.xlane.xlu2 %236 }
 0x153   :  { %v264_v48 = vsub.f32 %v2015_v50, %v237_v46  ;;  %v1090_v46 = vld [vmem:[#allocation11 + $0x60] sm:$0xff] }
 0x155   :  { %v2075_v39 = vpop.eup %1590  ;;  %v284_v49 = vmul.f32 1.442695, %v264_v48  ;;  %v858_v48 = vld [vmem:[#allocation8 + $0xb0] sm:$0xff] }
 0x156   :  { %248 = vmax.xlane.f32.xlu2 %v2072_v47  ;;  %314 = vadd.xlane.f32.xlu1 %v2075_v39 }
 0x157   :  { %1592 = vpow2.f32 %v284_v49 }
 0x15a   :  { %v239_v52 = vpop.xlane.xlu2 %238 }
 0x15b   :  { %v265_v23 = vsub.f32 %v2020_v56, %v239_v52  ;;  %v2090_v56 = vpack.c.bf16 %v1973_v25, %v1970_v24  ;;  %v1456_v24 = vor.u32 %v1547_v4, %v1453_v5  ;;  %v866_v25 = vld [vmem:[#allocation8 + $0xf0] sm:$0xff]  ;;  %v222_v52 = vpop.f32.mrf.mxu0  ;;  %v855_v4 = vld [vmem:[#allocation8 + $0x98] sm:$0xff]  ;;  %v1087_v5 = vld [vmem:[#allocation11 + $0x48] sm:$0xff] }
 0x15c   :  { %868 = vmatpush.msra.mxu3 %v866_v25  ;;  %v2114_v63 = vadd.f32 %v1982_v27, %v222_v52  ;;  %v1086_v25 = vld [vmem:[#allocation11 + $0x40] sm:$0xff]  ;;  %v838_v52 = vld [vmem:[#allocation8 + $0x10] sm:$0xff] }
 0x15d   :  { %v2084_v53 = vpop.eup %1592  ;;  %v286_v50 = vmul.f32 1.442695, %v265_v23  ;;  %734 = vmatmul.bf16.gmra.mxu1 %v2090_v56  ;;  %757 = vmatpush.bf16.msra.mxu2 %v1456_v24  ;;  %v1440_v23 = vor.u32 %v1543_v41, %v1437_v36  ;;  %v852_v24 = vld [vmem:[#allocation8 + $0x80] sm:$0xff]  ;;  %v842_v36 = vld [vmem:[#allocation8 + $0x30] sm:$0xff] }
 0x15e   :  { %250 = vmax.xlane.f32.xlu1 %v2081_v22  ;;  %316 = vadd.xlane.f32.xlu0 %v2084_v53  ;;  %v1082_v41 = vld [vmem:[#allocation11 + $0x20] sm:$0xff] }
 0x15f   :  { %1594 = vpow2.f32 %v286_v50  ;;  %869 = vmatpush.msra.mxu3 %v864_v15  ;;  %v857_v50 = vld [vmem:[#allocation8 + $0xa8] sm:$0xff] }
 0x160   :  { %938 = vmatpush.msrb.mxu0 %v857_v50  ;;  %v1413_v15 = vld [vmem:[#allocation7 + $0x8] sm:$0xf0]  ;;  %v836_v50 = vld [vmem:[#allocation8] sm:$0xff] }
 0x161   :  { %870 = vmatpush.msra.mxu3 %v862_v28  ;;  %758 = vmatpush.bf16.msra.mxu2 %v1448_v17  ;;  %v848_v28 = vld [vmem:[#allocation8 + $0x60] sm:$0xff]  ;;  %v1084_v17 = vld [vmem:[#allocation11 + $0x30] sm:$0xff] }
 0x162   :  { %v241_v2 = vpop.xlane.xlu0 %240  ;;  %939 = vmatpush.msrb.mxu0 %v855_v4 }
 0x163   :  { %v266_v6 = vsub.f32 %v2024_v58, %v241_v2  ;;  %v1092_v58 = vld [vmem:[#allocation11 + $0x70] sm:$0xff]  ;;  %871 = vmatpush.msra.mxu3 %v860_v20  ;;  %v225_v1 = vpop.f32.mrf.mxu0  ;;  %v843_v20 = vld [vmem:[#allocation8 + $0x38] sm:$0xff] }
 0x164   :  { %1095 = vmatpush.msrb.mxu1 %v1092_v58  ;;  %v2122_v26 = vadd.f32 %v1982_v27, %v225_v1  ;;  %v854_v2 = vld [vmem:[#allocation8 + $0x90] sm:$0xff]  ;;  %v853_v27 = vld [vmem:[#allocation8 + $0x88] sm:$0xff]  ;;  %v1416_v58 = vor.u32 %v1537_v14, %v1413_v15 }
 0x165   :  { %v2096_v8 = vpop.eup %1594  ;;  %v288_v10 = vmul.f32 1.442695, %v266_v6  ;;  %872 = vmatpush.msra.mxu3 %v858_v48  ;;  %759 = vmatpush.bf16.msra.mxu2 %v1440_v23  ;;  %v1539_v6 = vld [vmem:[#allocation7 + $0x14] sm:$0xf]  ;;  %v841_v48 = vld [vmem:[#allocation8 + $0x28] sm:$0xff] }
 0x166   :  { %318 = vadd.xlane.f32.xlu2 %v2096_v8  ;;  %252 = vmax.xlane.f32.xlu0 %v2093_v3  ;;  %v1079_v23 = vld [vmem:[#allocation11 + $0x8] sm:$0xff] }
 0x167   :  { %1596 = vpow2.f32 %v288_v10  ;;  %1096 = vmatpush.msrb.mxu1 %v1091_v34  ;;  %873 = vmatpush.msra.mxu3 %v856_v57  ;;  %v1424_v10 = vor.u32 %v1539_v6, %v1421_v7  ;;  %v1083_v34 = vld [vmem:[#allocation11 + $0x28] sm:$0xff] }
 0x168   :  { %940 = vmatpush.msrb.mxu0 %v853_v27 }
 0x169   :  { %1097 = vmatpush.msrb.mxu1 %v1090_v46  ;;  %874 = vmatpush.msra.mxu3 %v854_v2  ;;  %v840_v46 = vld [vmem:[#allocation8 + $0x20] sm:$0xff] }
 0x16a   :  { %v243_v33 = vpop.xlane.xlu2 %242  ;;  %941 = vmatpush.msrb.mxu0 %v851_v35 }
 0x16b   :  { %v267_v21 = vsub.f32 %v2028_v60, %v243_v33  ;;  %v1429_v60 = vld [vmem:[#allocation7 + $0x28] sm:$0xf0]  ;;  %1098 = vmatpush.msrb.mxu1 %v1089_v54  ;;  %875 = vmatpush.msra.mxu3 %v852_v24 }
 0x16c   :  { %v1432_v62 = vor.u32 %v1541_v55, %v1429_v60  ;;  %942 = vmatpush.msrb.mxu0 %v849_v31  ;;  %v845_v33 = vld [vmem:[#allocation8 + $0x48] sm:$0xff]  ;;  %v1078_v55 = vld [vmem:[#allocation11] sm:$0xff] }
 0x16d   :  { %v2105_v49 = vpop.eup %1596  ;;  %v290_v51 = vmul.f32 1.442695, %v267_v21  ;;  %1099 = vmatpush.msrb.mxu1 %v1088_v59  ;;  %876 = vmatpush.msra.mxu3 %v850_v32  ;;  %v1081_v21 = vld [vmem:[#allocation11 + $0x18] sm:$0xff]  ;;  %v837_v54 = vld [vmem:[#allocation8 + $0x8] sm:$0xff] }
 0x16e   :  { %254 = vmax.xlane.f32.xlu2 %v2102_v40  ;;  %320 = vadd.xlane.f32.xlu1 %v2105_v49 }
 0x16f   :  { %1598 = vpow2.f32 %v290_v51  ;;  %739 = vmatmul.bf16.gmra.mxu1 %v2111_v61  ;;  %760 = vmatpush.bf16.msra.mxu2 %v1432_v62  ;;  %v1080_v51 = vld [vmem:[#allocation11 + $0x10] sm:$0xff] }
 0x170   :  { %1100 = vmatpush.msrb.mxu1 %v1087_v5  ;;  %877 = vmatpush.msra.mxu3 %v848_v28 }
 0x171   :  { %943 = vmatpush.msrb.mxu0 %v847_v45 }
 0x172   :  { %1101 = vmatpush.msrb.mxu1 %v1086_v25  ;;  %878 = vmatpush.msra.mxu3 %v846_v38 }
 0x173   :  { %761 = vmatpush.bf16.msra.mxu2 %v1424_v10  ;;  %944 = vmatpush.msrb.mxu0 %v845_v33 }
 0x174   :  { %1102 = vmatpush.msrb.mxu1 %v1085_v12  ;;  %879 = vmatpush.msra.mxu3 %v844_v18 }
 0x175   :  { %v2116_v0 = vpop.eup %1598  ;;  %945 = vmatpush.msrb.mxu0 %v843_v20 }
 0x176   :  { %322 = vadd.xlane.f32.xlu0 %v2116_v0  ;;  %256 = vmax.xlane.f32.xlu1 %v2114_v63 }
 0x177   :  { %762 = vmatpush.bf16.msra.mxu2 %v1416_v58  ;;  %1103 = vmatpush.msrb.mxu1 %v1084_v17 }
 0x178   :  { %880 = vmatpush.msra.mxu3 %v842_v36  ;;  %946 = vmatpush.msrb.mxu0 %v841_v48 }
 0x179   :  { %1104 = vmatpush.msrb.mxu1 %v1083_v34 }
 0x17a   :  { %763 = vmatmul.bf16.vlgmr.msra.gmra.mxu2 %v2033_v9  ;;  %881 = vmatpush.msra.mxu3 %v840_v46  ;;  %v839_v9 = vld [vmem:[#allocation8 + $0x18] sm:$0xff] }
 0x17b   :  { %1105 = vmatpush.msrb.mxu1 %v1082_v41  ;;  %947 = vmatpush.msrb.mxu0 %v839_v9 }
 0x17c   :  { %882 = vmatpush.msra.mxu3 %v838_v52 }
 0x17d   :  { %1106 = vmatpush.msrb.mxu1 %v1081_v21  ;;  %948 = vmatpush.msrb.mxu0 %v837_v54 }
 0x17e   :  { %258 = vmax.xlane.f32.xlu0 %v2122_v26  ;;  %883 = vmatpush.msra.mxu3 %v836_v50 }
 0x17f   :  { %744 = vmatmul.bf16.gmra.mxu1 %v2127_v29 }
 0x180   :  { %1107 = vmatpush.msrb.mxu1 %v1080_v51 }
 0x182   :  { %1108 = vmatpush.msrb.mxu1 %v1079_v23 }
 0x184   :  { %1109 = vmatpush.msrb.mxu1 %v1078_v55 }
 0x18a   :  { %768 = vmatmul.bf16.gmra.mxu2 %v2039_v13 }
 0x18f   :  { %749 = vmatmul.bf16.gmra.mxu1 %v2132_v11 }
 0x19a   :  { %773 = vmatmul.bf16.gmra.mxu2 %v2052_v19 }
 0x1aa   :  { %778 = vmatmul.bf16.gmra.mxu2 %v2069_v44 }
 0x1b1   :  { %v309_v60 = vpop.xlane.xlu1 %308 }
 0x1b2   :  { %1600 = vrcp.f32 %v309_v60  ;;  %v351_v7 = vand.u32 2147483648, %v309_v60  ;;  %v349_v10 = vand.u32 2147483647, %v309_v60  ;;  %vm345_vm1 = vweird.f32 %v309_v60 }
 0x1b4   :  { %v352_v27 = vor.u32 1.1754944e-38, %v351_v7  ;;  %vm350_vm3 = vcmp.eq.f32.partialorder %v349_v10, 8.507059e+37 }
 0x1b8   :  { %v1601_v57 = vpop.eup %1600 }
 0x1b9   :  { %v341_v59 = vmul.f32 %v1601_v57, %v309_v60  ;;  %v245_v62 = vpop.xlane.xlu1 %244  ;;  %v311_v1 = vpop.xlane.xlu0 %310  ;;  %vm346_vm0 = vweird.f32 %v1601_v57 }
 0x1ba   :  { %v268_v2 = vsub.f32 %v2047_v30, %v245_v62  ;;  %1602 = vrcp.f32 %v311_v1  ;;  %vm347_vm2 = vmor %vm345_vm1, %vm346_vm0  ;;  %v365_v31 = vand.u32 2147483648, %v311_v1  ;;  %v363_v38 = vand.u32 2147483647, %v311_v1  ;;  %783 = vmatmul.bf16.gmra.mxu2 %v2090_v56 }
 0x1bb   :  { %v342_v4 = vsub.f32 1.0, %v341_v59  ;;  %vm359_vm5 = vweird.f32 %v311_v1 }
 0x1bc   :  { %v292_v5 = vmul.f32 1.442695, %v268_v2  ;;  %v366_v34 = vor.u32 1.1754944e-38, %v365_v31  ;;  %vm364_vm7 = vcmp.eq.f32.partialorder %v363_v38, 8.507059e+37  ;;  %v1568_v38 = vld [vmem:[#allocation10 + $0x78] sm:$0xff] }
 0x1bd   :  { %v343_v6 = vmul.f32 %v1601_v57, %v342_v4  ;;  %1304 = vmatpush.bf16.msrb.mxu3 %v1568_v38  ;;  %v1566_v38 = vld [vmem:[#allocation10 + $0x68] sm:$0xff] }
 0x1be   :  { %1604 = vpow2.f32 %v292_v5 }
 0x1bf   :  { %v344_v24 = vadd.f32 %v1601_v57, %v343_v6 }
 0x1c0   :  { %v1603_v13 = vpop.eup %1602 }
 0x1c1   :  { %v355_v25 = vmul.f32 %v1603_v13, %v311_v1  ;;  %v313_v32 = vpop.xlane.xlu2 %312  ;;  %v247_v35 = vpop.xlane.xlu0 %246  ;;  %v348_v12 = vsel %vm347_vm2, %v1601_v57, %v344_v24  ;;  %vm360_vm4 = vweird.f32 %v1603_v13 }
 0x1c2   :  { %1606 = vrcp.f32 %v313_v32  ;;  %v269_v14 = vsub.f32 %v2060_v42, %v247_v35  ;;  %v353_v19 = vsel %vm350_vm3, %v352_v27, %v348_v12  ;;  %vm361_vm6 = vmor %vm359_vm5, %vm360_vm4  ;;  %v379_v9 = vand.u32 2147483648, %v313_v32 }
 0x1c3   :  { %v356_v30 = vsub.f32 1.0, %v355_v25  ;;  %v564_v58 = vmul.f32 %v2043_v16, %v353_v19  ;;  %v377_v23 = vand.u32 2147483647, %v313_v32  ;;  %vm373_vm9 = vweird.f32 %v313_v32 }
 0x1c4   :  { %v2140_v15 = vpop.eup %1604  ;;  %v294_v17 = vmul.f32 1.442695, %v269_v14 }
 0x1c5   :  { %v357_v28 = vmul.f32 %v1603_v13, %v356_v30  ;;  %324 = vadd.xlane.f32.xlu2 %v2140_v15  ;;  %580 = vst [vmem:[#allocation14] sm:$0xff] %v564_v58  ;;  %884 = vmatmul.f32.vlgmr.msra.gmra.mxu3 %v564_v58  ;;  %vm378_vm11 = vcmp.eq.f32.partialorder %v377_v23, 8.507059e+37 }
 0x1c6   :  { %949 = vmatmul.f32.vlgmr.msrb.gmra.mxu0 %v564_v58  ;;  %1608 = vpow2.f32 %v294_v17  ;;  %1110 = vmatmul.f32.vlgmr.msrb.gmra.mxu1 %v564_v58 }
 0x1c7   :  { %v358_v45 = vadd.f32 %v1603_v13, %v357_v28 }
 0x1c8   :  { %v1607_v42 = vpop.eup %1606 }
 0x1c9   :  { %v369_v18 = vmul.f32 %v1607_v42, %v313_v32  ;;  %v249_v33 = vpop.xlane.xlu2 %248  ;;  %v315_v16 = vpop.xlane.xlu1 %314  ;;  %v362_v41 = vsel %vm361_vm6, %v1603_v13, %v358_v45  ;;  %vm374_vm8 = vweird.f32 %v1607_v42 }
 0x1ca   :  { %v270_v36 = vsub.f32 %v2072_v47, %v249_v33  ;;  %1610 = vrcp.f32 %v315_v16  ;;  %v367_v21 = vsel %vm364_vm7, %v366_v34, %v362_v41  ;;  %vm375_vm10 = vmor %vm373_vm9, %vm374_vm8  ;;  %v393_v6 = vand.u32 2147483648, %v315_v16  ;;  %788 = vmatmul.bf16.gmra.mxu2 %v2111_v61 }
 0x1cb   :  { %v370_v20 = vsub.f32 1.0, %v369_v18  ;;  %v565_v48 = vmul.f32 %v2054_v37, %v367_v21  ;;  %v380_v37 = vor.u32 1.1754944e-38, %v379_v9  ;;  %v391_v7 = vand.u32 2147483647, %v315_v16 }
 0x1cc   :  { %v296_v46 = vmul.f32 1.442695, %v270_v36  ;;  %v2147_v51 = vpop.eup %1608  ;;  %vm387_vm13 = vweird.f32 %v315_v16  ;;  %v394_v24 = vor.u32 1.1754944e-38, %v393_v6  ;;  %v1567_v6 = vld [vmem:[#allocation10 + $0x70] sm:$0xff] }
 0x1cd   :  { %v371_v52 = vmul.f32 %v1607_v42, %v370_v20  ;;  %581 = vst [vmem:[#allocation14 + $0x8] sm:$0xff] %v565_v48  ;;  %887 = vmatmul.f32.gmra.mxu3 %v565_v48  ;;  %326 = vadd.xlane.f32.xlu1 %v2147_v51  ;;  %vm392_vm15 = vcmp.eq.f32.partialorder %v391_v7, 8.507059e+37 }
 0x1ce   :  { %1612 = vpow2.f32 %v296_v46  ;;  %952 = vmatmul.f32.gmra.mxu0 %v565_v48  ;;  %1113 = vmatmul.f32.gmra.mxu1 %v565_v48 }
 0x1cf   :  { %v372_v50 = vadd.f32 %v1607_v42, %v371_v52  ;;  %1305 = vmatpush.bf16.msrb.mxu3 %v1567_v6 }
 0x1d0   :  { %v1611_v47 = vpop.eup %1610 }
 0x1d1   :  { %v383_v54 = vmul.f32 %v1611_v47, %v315_v16  ;;  %v251_v44 = vpop.xlane.xlu1 %250  ;;  %v317_v55 = vpop.xlane.xlu0 %316  ;;  %v376_v60 = vsel %vm375_vm10, %v1607_v42, %v372_v50  ;;  %vm388_vm12 = vweird.f32 %v1611_v47 }
 0x1d2   :  { %v271_v57 = vsub.f32 %v2081_v22, %v251_v44  ;;  %1614 = vrcp.f32 %v317_v55  ;;  %v381_v62 = vsel %vm378_vm11, %v380_v37, %v376_v60  ;;  %vm389_vm14 = vmor %vm387_vm13, %vm388_vm12  ;;  %v407_v58 = vand.u32 2147483648, %v317_v55 }
 0x1d3   :  { %v384_v59 = vsub.f32 1.0, %v383_v54  ;;  %v566_v4 = vmul.f32 %v2063_v43, %v381_v62  ;;  %v405_v31 = vand.u32 2147483647, %v317_v55  ;;  %vm401_vm1 = vweird.f32 %v317_v55  ;;  %1306 = vmatpush.bf16.msrb.mxu3 %v1566_v38 }
 0x1d4   :  { %v2151_v1 = vpop.eup %1612  ;;  %v298_v2 = vmul.f32 1.442695, %v271_v57 }
 0x1d5   :  { %v385_v5 = vmul.f32 %v1611_v47, %v384_v59  ;;  %328 = vadd.xlane.f32.xlu2 %v2151_v1  ;;  %582 = vst [vmem:[#allocation14 + $0x10] sm:$0xff] %v566_v4  ;;  %890 = vmatmul.f32.gmra.mxu3 %v566_v4  ;;  %vm406_vm3 = vcmp.eq.f32.partialorder %v405_v31, 8.507059e+37 }
 0x1d6   :  { %1616 = vpow2.f32 %v298_v2  ;;  %955 = vmatmul.f32.gmra.mxu0 %v566_v4  ;;  %1116 = vmatmul.f32.gmra.mxu1 %v566_v4 }
 0x1d7   :  { %v386_v10 = vadd.f32 %v1611_v47, %v385_v5  ;;  %v1559_v5 = vld [vmem:[#allocation10 + $0x30] sm:$0xff] }
 0x1d8   :  { %v1615_v22 = vpop.eup %1614 }
 0x1d9   :  { %v397_v13 = vmul.f32 %v1615_v22, %v317_v55  ;;  %v2155_v27 = vpop.xlane.xlu2 %318  ;;  %v253_v43 = vpop.xlane.xlu0 %252  ;;  %v390_v25 = vsel %vm389_vm14, %v1611_v47, %v386_v10  ;;  %vm402_vm0 = vweird.f32 %v1615_v22 }
 0x1da   :  { %1618 = vrcp.f32 %v2155_v27  ;;  %v272_v35 = vsub.f32 %v2093_v3, %v253_v43  ;;  %v395_v12 = vsel %vm392_vm15, %v394_v24, %v390_v25  ;;  %v1560_v3 = vld [vmem:[#allocation10 + $0x38] sm:$0xff]  ;;  %vm403_vm2 = vmor %vm401_vm1, %vm402_vm0  ;;  %v421_v48 = vand.u32 2147483648, %v2155_v27  ;;  %793 = vmatmul.bf16.gmra.mxu2 %v2127_v29  ;;  %v715_v29 = vpop.f32.mrf.mxu1 }
 0x1db   :  { %v398_v32 = vsub.f32 1.0, %v397_v13  ;;  %v567_v14 = vmul.f32 %v2075_v39, %v395_v12  ;;  %v408_v39 = vor.u32 1.1754944e-38, %v407_v58  ;;  %1255 = vmatpush.bf16.msrb.mxu2 %v1560_v3  ;;  %v419_v52 = vand.u32 2147483647, %v2155_v27  ;;  %v1557_v3 = vld [vmem:[#allocation10 + $0x20] sm:$0xff] }
 0x1dc   :  { %v2159_v30 = vpop.eup %1616  ;;  %v300_v28 = vmul.f32 1.442695, %v272_v35  ;;  %vm415_vm5 = vweird.f32 %v2155_v27 }
 0x1dd   :  { %v399_v19 = vmul.f32 %v1615_v22, %v398_v32  ;;  %330 = vadd.xlane.f32.xlu0 %v2159_v30  ;;  %583 = vst [vmem:[#allocation14 + $0x18] sm:$0xff] %v567_v14  ;;  %893 = vmatmul.f32.gmra.mxu3 %v567_v14  ;;  %vm420_vm7 = vcmp.eq.f32.partialorder %v419_v52, 8.507059e+37 }
 0x1de   :  { %958 = vmatmul.f32.gmra.mxu0 %v567_v14  ;;  %1620 = vpow2.f32 %v300_v28  ;;  %1119 = vmatmul.f32.gmra.mxu1 %v567_v14 }
 0x1df   :  { %v400_v17 = vadd.f32 %v1615_v22, %v399_v19  ;;  %1256 = vmatpush.bf16.msrb.mxu2 %v1559_v5 }
 0x1e0   :  { %v1619_v45 = vpop.eup %1618 }
 0x1e1   :  { %v411_v56 = vmul.f32 %v1619_v45, %v2155_v27  ;;  %v255_v42 = vpop.xlane.xlu2 %254  ;;  %v321_v34 = vpop.xlane.xlu1 %320  ;;  %v404_v18 = vsel %vm403_vm2, %v1615_v22, %v400_v17  ;;  %vm416_vm4 = vweird.f32 %v1619_v45  ;;  %v1558_v17 = vld [vmem:[#allocation10 + $0x28] sm:$0xff] }
 0x1e2   :  { %v273_v33 = vsub.f32 %v2102_v40, %v255_v42  ;;  %1622 = vrcp.f32 %v321_v34  ;;  %v409_v41 = vsel %vm406_vm3, %v408_v39, %v404_v18  ;;  %vm417_vm6 = vmor %vm415_vm5, %vm416_vm4  ;;  %v435_v57 = vand.u32 2147483648, %v321_v34  ;;  %v1554_v39 = vld [vmem:[#allocation10 + $0x8] sm:$0xff]  ;;  %v1565_v42 = vld [vmem:[#allocation10 + $0x60] sm:$0xff] }
 0x1e3   :  { %v412_v16 = vsub.f32 1.0, %v411_v56  ;;  %v568_v20 = vmul.f32 %v2084_v53, %v409_v41  ;;  %v422_v53 = vor.u32 1.1754944e-38, %v421_v48  ;;  %v433_v4 = vand.u32 2147483647, %v321_v34  ;;  %1257 = vmatpush.bf16.msrb.mxu2 %v1558_v17  ;;  %v1553_v56 = vld [vmem:[#allocation10] sm:$0xff]  ;;  %1307 = vmatpush.bf16.msrb.mxu3 %v1565_v42 }
 0x1e4   :  { %v302_v36 = vmul.f32 1.442695, %v273_v33  ;;  %v2168_v21 = vpop.eup %1620  ;;  %vm429_vm9 = vweird.f32 %v321_v34  ;;  %v436_v10 = vor.u32 1.1754944e-38, %v435_v57 }
 0x1e5   :  { %v413_v46 = vmul.f32 %v1619_v45, %v412_v16  ;;  %584 = vst [vmem:[#allocation14 + $0x20] sm:$0xff] %v568_v20  ;;  %896 = vmatmul.f32.gmra.mxu3 %v568_v20  ;;  %332 = vadd.xlane.f32.xlu1 %v2168_v21  ;;  %vm434_vm11 = vcmp.eq.f32.partialorder %v433_v4, 8.507059e+37 }
 0x1e6   :  { %1624 = vpow2.f32 %v302_v36  ;;  %961 = vmatmul.f32.gmra.mxu0 %v568_v20  ;;  %1122 = vmatmul.f32.gmra.mxu1 %v568_v20 }
 0x1e7   :  { %v414_v9 = vadd.f32 %v1619_v45, %v413_v46  ;;  %1258 = vmatpush.bf16.msrb.mxu2 %v1557_v3  ;;  %v2194_v46 = vld [vmem:[%s2280_s4] sm:$0x3]  ;;  %s1864_s4 = smov [#allocation14]  }
 0x1e8   :  { %v1623_v40 = vpop.eup %1622  ;;  %v2197_v52 = vperm.slane %v2194_v46, 0  ;;  %s1386_s22 = sshll.u32 %s1864_s4, 4  ;;  %s1387_s22 = int_to_ptr.vmem [resolvable:$true] %s1386_s22 }
 0x1e9   :  { %v425_v23 = vmul.f32 %v1623_v40, %v321_v34  ;;  %v257_v50 = vpop.xlane.xlu1 %256  ;;  %v323_v47 = vpop.xlane.xlu0 %322  ;;  %v418_v37 = vsel %vm417_vm6, %v1619_v45, %v414_v9  ;;  %vm430_vm8 = vweird.f32 %v1623_v40  ;;  %v1556_v45 = vld [vmem:[#allocation10 + $0x18] sm:$0xff] }
 0x1ea   :  { %v274_v54 = vsub.f32 %v2114_v63, %v257_v50  ;;  %1626 = vrcp.f32 %v323_v47  ;;  %v423_v55 = vsel %vm420_vm7, %v422_v53, %v418_v37  ;;  %vm431_vm10 = vmor %vm429_vm9, %vm430_vm8  ;;  %v449_v32 = vand.u32 2147483648, %v323_v47  ;;  %798 = vmatmul.bf16.gmra.mxu2 %v2132_v11  ;;  %v717_v11 = vpop.f32.mrf.mxu1 }
 0x1eb   :  { %v426_v44 = vsub.f32 1.0, %v425_v23  ;;  %v569_v62 = vmul.f32 %v2096_v8, %v423_v55  ;;  %v447_v14 = vand.u32 2147483647, %v323_v47  ;;  %vm443_vm13 = vweird.f32 %v323_v47  ;;  %1259 = vmatpush.bf16.msrb.mxu2 %v1556_v45 }
 0x1ec   :  { %v2175_v60 = vpop.eup %1624  ;;  %v304_v59 = vmul.f32 1.442695, %v274_v54  ;;  %v718_v55 = vadd.f32 %v717_v11, %v2197_v52 }
 0x1ed   :  { %v427_v2 = vmul.f32 %v1623_v40, %v426_v44  ;;  %334 = vadd.xlane.f32.xlu2 %v2175_v60  ;;  %585 = vst [vmem:[#allocation14 + $0x28] sm:$0xff] %v569_v62  ;;  %899 = vmatmul.f32.gmra.mxu3 %v569_v62  ;;  %vm448_vm15 = vcmp.eq.f32.partialorder %v447_v14, 8.507059e+37  ;;  %v716_v44 = vadd.f32 %v715_v29, %v2197_v52 }
 0x1ee   :  { %1628 = vpow2.f32 %v304_v59  ;;  %964 = vmatmul.f32.gmra.mxu0 %v569_v62  ;;  %1125 = vmatmul.f32.gmra.mxu1 %v569_v62  ;;  %v806_v6 = vmax.f32 %v718_v55, 0.0 }
 0x1ef   :  { %v428_v63 = vadd.f32 %v1623_v40, %v427_v2  ;;  %v804_v5 = vmax.f32 %v716_v44, 0.0 }
 0x1f0   :  { %v1627_v7 = vpop.eup %1626 }
 0x1f1   :  { %v439_v8 = vmul.f32 %v1627_v7, %v323_v47  ;;  %v259_v61 = vpop.xlane.xlu0 %258  ;;  %v432_v22 = vsel %vm431_vm10, %v1623_v40, %v428_v63  ;;  %vm444_vm12 = vweird.f32 %v1627_v7  ;;  %v1564_v47 = vld [vmem:[#allocation10 + $0x58] sm:$0xff] }
 0x1f2   :  { %v275_v24 = vsub.f32 %v2122_v26, %v259_v61  ;;  %v437_v13 = vsel %vm434_vm11, %v436_v10, %v432_v22  ;;  %vm445_vm14 = vmor %vm443_vm13, %vm444_vm12  ;;  %v450_v26 = vor.u32 1.1754944e-38, %v449_v32  ;;  %v2199_v9 = vpop.f32.mrf.mxu1  ;;  %1308 = vmatpush.bf16.msrb.mxu3 %v1564_v47 }
 0x1f3   :  { %v440_v27 = vsub.f32 1.0, %v439_v8  ;;  %v570_v43 = vmul.f32 %v2105_v49, %v437_v13 }
 0x1f4   :  { %v2182_v25 = vpop.eup %1628  ;;  %v306_v35 = vmul.f32 1.442695, %v275_v24 }
 0x1f5   :  { %v441_v12 = vmul.f32 %v1627_v7, %v440_v27  ;;  %336 = vadd.xlane.f32.xlu0 %v2182_v25  ;;  %586 = vst [vmem:[#allocation14 + $0x30] sm:$0xff] %v570_v43  ;;  %902 = vmatmul.f32.gmra.mxu3 %v570_v43 }
 0x1f6   :  { %1630 = vpow2.f32 %v306_v35  ;;  %967 = vmatmul.f32.gmra.mxu0 %v570_v43  ;;  %1128 = vmatmul.f32.gmra.mxu1 %v570_v43 }
 0x1f7   :  { %v442_v19 = vadd.f32 %v1627_v7, %v441_v12 }
 0x1f9   :  { %v446_v49 = vsel %vm445_vm14, %v1627_v7, %v442_v19 }
 0x1fa   :  { %v451_v58 = vsel %vm448_vm15, %v450_v26, %v446_v49  ;;  %v722_v8 = vpop.f32.mrf.mxu1 }
 0x1fb   :  { %v571_v28 = vmul.f32 %v2116_v0, %v451_v58  ;;  %v1555_v0 = vld [vmem:[#allocation10 + $0x10] sm:$0xff] }
 0x1fc   :  { %v2186_v31 = vpop.eup %1630  ;;  %1260 = vmatpush.bf16.msrb.mxu2 %v1555_v0  ;;  %v1563_v0 = vld [vmem:[#allocation10 + $0x50] sm:$0xff] }
 0x1fd   :  { %587 = vst [vmem:[#allocation14 + $0x38] sm:$0xff] %v571_v28  ;;  %338 = vadd.xlane.f32.xlu1 %v2186_v31  ;;  %905 = vmatmul.f32.gmra.mxu3 %v571_v28 }
 0x1fe   :  { %970 = vmatmul.f32.gmra.mxu0 %v571_v28  ;;  %1131 = vmatmul.f32.gmra.mxu1 %v571_v28 }
 0x1ff   :  { %1309 = vmatpush.bf16.msrb.mxu3 %v1563_v0 }
 0x200   :  { %1261 = vmatpush.bf16.msrb.mxu2 %v1554_v39 }
 0x202   :  { %v725_v42 = vpop.f32.mrf.mxu1 }
 0x204   :  { %1262 = vmatpush.bf16.msrb.mxu2 %v1553_v56  ;;  %v721_v56 = vadd.f32 %v2199_v9, %v2197_v52 }
 0x238   :  { %v325_v34 = vpop.xlane.xlu2 %324 }
 0x239   :  { %1632 = vrcp.f32 %v325_v34  ;;  %v463_v20 = vand.u32 2147483648, %v325_v34  ;;  %v461_v48 = vand.u32 2147483647, %v325_v34  ;;  %vm457_vm1 = vweird.f32 %v325_v34 }
 0x23b   :  { %v464_v53 = vor.u32 1.1754944e-38, %v463_v20  ;;  %vm462_vm3 = vcmp.eq.f32.partialorder %v461_v48, 8.507059e+37 }
 0x23f   :  { %v1633_v18 = vpop.eup %1632 }
 0x240   :  { %v453_v33 = vmul.f32 %v1633_v18, %v325_v34  ;;  %v327_v41 = vpop.xlane.xlu1 %326  ;;  %vm458_vm0 = vweird.f32 %v1633_v18 }
 0x241   :  { %1634 = vrcp.f32 %v327_v41  ;;  %vm459_vm2 = vmor %vm457_vm1, %vm458_vm0  ;;  %v475_v4 = vand.u32 2147483647, %v327_v41  ;;  %v477_v63 = vand.u32 2147483648, %v327_v41  ;;  %vm471_vm5 = vweird.f32 %v327_v41 }
 0x242   :  { %v454_v16 = vsub.f32 1.0, %v453_v33 }
 0x243   :  { %vm476_vm7 = vcmp.eq.f32.partialorder %v475_v4, 8.507059e+37 }
 0x244   :  { %v455_v36 = vmul.f32 %v1633_v18, %v454_v16 }
 0x246   :  { %v456_v40 = vadd.f32 %v1633_v18, %v455_v36  ;;  %v808_v36 = vmax.f32 %v721_v56, 0.0 }
 0x247   :  { %v1635_v37 = vpop.eup %1634 }
 0x248   :  { %v329_v23 = vpop.xlane.xlu2 %328  ;;  %v460_v50 = vsel %vm459_vm2, %v1633_v18, %v456_v40  ;;  %v885_v54 = vpop.f32.mrf.mxu3  ;;  %v467_v57 = vmul.f32 %v1635_v37, %v327_v41  ;;  %vm472_vm4 = vweird.f32 %v1635_v37 }
 0x249   :  { %1636 = vrcp.f32 %v329_v23  ;;  %v465_v59 = vsel %vm462_vm3, %v464_v53, %v460_v50  ;;  %vm473_vm6 = vmor %vm471_vm5, %vm472_vm4  ;;  %v998_v27 = vmul.f32 %v885_v54, %v804_v5  ;;  %v489_v12 = vand.u32 2147483647, %v329_v23  ;;  %v2211_v50 = vpop.f32.mrf.mxu2 }
 0x24a   :  { %v572_v62 = vmul.f32 %v2140_v15, %v465_v59  ;;  %v468_v2 = vsub.f32 1.0, %v467_v57  ;;  %v478_v15 = vor.u32 1.1754944e-38, %v477_v63  ;;  %v491_v14 = vand.u32 2147483648, %v329_v23  ;;  %v727_v59 = vpop.f32.mrf.mxu1 }
 0x24b   :  { %vm485_vm9 = vweird.f32 %v329_v23  ;;  %vm490_vm11 = vcmp.eq.f32.partialorder %v489_v12, 8.507059e+37 }
 0x24c   :  { %588 = vst [vmem:[#allocation14 + $0x40] sm:$0xff] %v572_v62  ;;  %908 = vmatmul.f32.gmra.mxu3 %v572_v62  ;;  %973 = vmatmul.f32.gmra.mxu0 %v572_v62  ;;  %v469_v7 = vmul.f32 %v1635_v37, %v468_v2  ;;  %v492_v3 = vor.u32 1.1754944e-38, %v491_v14 }
 0x24d   :  { %1134 = vmatmul.f32.gmra.mxu1 %v572_v62 }
 0x24e   :  { %v470_v61 = vadd.f32 %v1635_v37, %v469_v7  ;;  %v1561_v7 = vld [vmem:[#allocation10 + $0x40] sm:$0xff] }
 0x24f   :  { %v1637_v10 = vpop.eup %1636 }
 0x250   :  { %v481_v22 = vmul.f32 %v1637_v10, %v329_v23  ;;  %v331_v24 = vpop.xlane.xlu0 %330  ;;  %v888_v13 = vpop.f32.mrf.mxu3  ;;  %v474_v35 = vsel %vm473_vm6, %v1635_v37, %v470_v61  ;;  %vm486_vm8 = vweird.f32 %v1637_v10 }
 0x251   :  { %1638 = vrcp.f32 %v331_v24  ;;  %v1000_v32 = vmul.f32 %v888_v13, %v806_v6  ;;  %v479_v19 = vsel %vm476_vm7, %v478_v15, %v474_v35  ;;  %vm487_vm10 = vmor %vm485_vm9, %vm486_vm8  ;;  %v505_v16 = vand.u32 2147483648, %v331_v24 }
 0x252   :  { %v482_v43 = vsub.f32 1.0, %v481_v22  ;;  %v573_v58 = vmul.f32 %v2147_v51, %v479_v19  ;;  %v723_v51 = vadd.f32 %v722_v8, %v2197_v52  ;;  %v503_v41 = vand.u32 2147483647, %v331_v24 }
 0x253   :  { %v1030_v49 = vpack.c.bf16 %v1000_v32, %v998_v27  ;;  %vm499_vm13 = vweird.f32 %v331_v24  ;;  %v506_v9 = vor.u32 1.1754944e-38, %v505_v16  ;;  %v728_v15 = vadd.f32 %v727_v59, %v2197_v52 }
 0x254   :  { %v483_v26 = vmul.f32 %v1637_v10, %v482_v43  ;;  %589 = vst [vmem:[#allocation14 + $0x48] sm:$0xff] %v573_v58  ;;  %911 = vmatmul.f32.gmra.mxu3 %v573_v58  ;;  %976 = vmatmul.f32.gmra.mxu0 %v573_v58  ;;  %v810_v20 = vmax.f32 %v723_v51, 0.0  ;;  %vm504_vm15 = vcmp.eq.f32.partialorder %v503_v41, 8.507059e+37  ;;  %v2218_v43 = vpop.f32.mrf.mxu2 }
 0x255   :  { %1137 = vmatmul.f32.gmra.mxu1 %v573_v58  ;;  %1263 = vmatmul.bf16.vlgmr.msrb.gmra.mxu2 %v1030_v49  ;;  %v814_v49 = vmax.f32 %v728_v15, 0.0  ;;  %v730_v58 = vpop.f32.mrf.mxu1 }
 0x256   :  { %v484_v28 = vadd.f32 %v1637_v10, %v483_v26 }
 0x257   :  { %v1639_v17 = vpop.eup %1638 }
 0x258   :  { %v495_v38 = vmul.f32 %v1639_v17, %v331_v24  ;;  %v488_v45 = vsel %vm487_vm10, %v1637_v10, %v484_v28  ;;  %v891_v39 = vpop.f32.mrf.mxu3  ;;  %v333_v11 = vpop.xlane.xlu1 %332  ;;  %vm500_vm12 = vweird.f32 %v1639_v17 }
 0x259   :  { %v493_v29 = vsel %vm490_vm11, %v492_v3, %v488_v45  ;;  %1640 = vrcp.f32 %v333_v11  ;;  %vm501_vm14 = vmor %vm499_vm13, %vm500_vm12  ;;  %v1002_v37 = vmul.f32 %v891_v39, %v808_v36  ;;  %v519_v4 = vand.u32 2147483648, %v333_v11  ;;  %v2224_v3 = vpop.f32.mrf.mxu0 }
 0x25a   :  { %v496_v34 = vsub.f32 1.0, %v495_v38  ;;  %v574_v18 = vmul.f32 %v2151_v1, %v493_v29  ;;  %v1562_v1 = vld [vmem:[#allocation10 + $0x48] sm:$0xff]  ;;  %v517_v5 = vand.u32 2147483647, %v333_v11  ;;  %vm513_vm1 = vweird.f32 %v333_v11 }
 0x25b   :  { %1310 = vmatpush.bf16.msrb.mxu3 %v1562_v1  ;;  %v520_v22 = vor.u32 1.1754944e-38, %v519_v4  ;;  %v2233_v4 = vperm.slane %v2194_v46, 1 }
 0x25c   :  { %v497_v33 = vmul.f32 %v1639_v17, %v496_v34  ;;  %590 = vst [vmem:[#allocation14 + $0x50] sm:$0xff] %v574_v18  ;;  %914 = vmatmul.f32.gmra.mxu3 %v574_v18  ;;  %979 = vmatmul.f32.gmra.mxu0 %v574_v18  ;;  %vm518_vm3 = vcmp.eq.f32.partialorder %v517_v5, 8.507059e+37  ;;  %v2227_v41 = vpop.f32.mrf.mxu2 }
 0x25d   :  { %1140 = vmatmul.f32.gmra.mxu1 %v574_v18 }
 0x25e   :  { %v498_v48 = vadd.f32 %v1639_v17, %v497_v33 }
 0x25f   :  { %v1641_v23 = vpop.eup %1640  ;;  %1311 = vmatpush.bf16.msrb.mxu3 %v1561_v7 }
 0x260   :  { %v2209_v40 = vpop.xlane.xlu2 %334  ;;  %v502_v53 = vsel %vm501_vm14, %v1639_v17, %v498_v48  ;;  %v894_v47 = vpop.f32.mrf.mxu3  ;;  %v509_v54 = vmul.f32 %v1641_v23, %v333_v11  ;;  %vm514_vm0 = vweird.f32 %v1641_v23 }
 0x261   :  { %1642 = vrcp.f32 %v2209_v40  ;;  %v1004_v44 = vmul.f32 %v894_v47, %v810_v20  ;;  %v507_v55 = vsel %vm504_vm15, %v506_v9, %v502_v53  ;;  %vm515_vm2 = vmor %vm513_vm1, %vm514_vm0  ;;  %v533_v12 = vand.u32 2147483648, %v2209_v40  ;;  %v732_v9 = vpop.f32.mrf.mxu1  ;;  %v953_v1 = vpop.f32.mrf.mxu0 }
 0x262   :  { %v575_v57 = vmul.f32 %v2159_v30, %v507_v55  ;;  %v510_v62 = vsub.f32 1.0, %v509_v54  ;;  %v726_v30 = vadd.f32 %v725_v42, %v2197_v52  ;;  %v531_v19 = vand.u32 2147483647, %v2209_v40 }
 0x263   :  { %v1032_v2 = vpack.c.bf16 %v1004_v44, %v1002_v37  ;;  %vm527_vm5 = vweird.f32 %v2209_v40  ;;  %v534_v45 = vor.u32 1.1754944e-38, %v533_v12  ;;  %v731_v53 = vadd.f32 %v730_v58, %v2197_v52 }
 0x264   :  { %591 = vst [vmem:[#allocation14 + $0x58] sm:$0xff] %v575_v57  ;;  %v511_v63 = vmul.f32 %v1641_v23, %v510_v62  ;;  %917 = vmatmul.f32.gmra.mxu3 %v575_v57  ;;  %982 = vmatmul.f32.gmra.mxu0 %v575_v57  ;;  %v812_v26 = vmax.f32 %v726_v30, 0.0  ;;  %vm532_vm7 = vcmp.eq.f32.partialorder %v531_v19, 8.507059e+37  ;;  %v733_v37 = vadd.f32 %v732_v9, %v2197_v52  ;;  %v771_v5 = vpop.f32.mrf.mxu2 }
 0x265   :  { %1143 = vmatmul.f32.gmra.mxu1 %v575_v57  ;;  %1268 = vmatmul.bf16.gmra.mxu2 %v1032_v2  ;;  %v816_v62 = vmax.f32 %v731_v53, 0.0 }
 0x266   :  { %v512_v10 = vadd.f32 %v1641_v23, %v511_v63  ;;  %v818_v2 = vmax.f32 %v733_v37, 0.0 }
 0x267   :  { %v1643_v6 = vpop.eup %1642 }
 0x268   :  { %v523_v8 = vmul.f32 %v1643_v6, %v2209_v40  ;;  %v337_v61 = vpop.xlane.xlu0 %336  ;;  %v897_v24 = vpop.f32.mrf.mxu3  ;;  %v516_v27 = vsel %vm515_vm2, %v1641_v23, %v512_v10  ;;  %vm528_vm4 = vweird.f32 %v1643_v6 }
 0x269   :  { %1644 = vrcp.f32 %v337_v61  ;;  %v521_v32 = vsel %vm518_vm3, %v520_v22, %v516_v27  ;;  %vm529_vm6 = vmor %vm527_vm5, %vm528_vm4  ;;  %v1006_v29 = vmul.f32 %v897_v24, %v812_v26  ;;  %v547_v34 = vand.u32 2147483648, %v337_v61  ;;  %v956_v24 = vpop.f32.mrf.mxu0 }
 0x26a   :  { %v524_v13 = vsub.f32 1.0, %v523_v8  ;;  %v576_v14 = vmul.f32 %v2168_v21, %v521_v32  ;;  %v545_v33 = vand.u32 2147483647, %v337_v61  ;;  %vm541_vm9 = vweird.f32 %v337_v61 }
 0x26b   :  { %v548_v48 = vor.u32 1.1754944e-38, %v547_v34 }
 0x26c   :  { %v525_v35 = vmul.f32 %v1643_v6, %v524_v13  ;;  %592 = vst [vmem:[#allocation14 + $0x60] sm:$0xff] %v576_v14  ;;  %920 = vmatmul.f32.gmra.mxu3 %v576_v14  ;;  %985 = vmatmul.f32.gmra.mxu0 %v576_v14  ;;  %vm546_vm11 = vcmp.eq.f32.partialorder %v545_v33, 8.507059e+37  ;;  %v774_v32 = vpop.f32.mrf.mxu2 }
 0x26d   :  { %1146 = vmatmul.f32.gmra.mxu1 %v576_v14 }
 0x26e   :  { %v526_v28 = vadd.f32 %v1643_v6, %v525_v35 }
 0x26f   :  { %v1645_v17 = vpop.eup %1644 }
 0x270   :  { %v530_v38 = vsel %vm529_vm6, %v1643_v6, %v526_v28  ;;  %v537_v0 = vmul.f32 %v1645_v17, %v337_v61  ;;  %v339_v21 = vpop.xlane.xlu1 %338  ;;  %v900_v39 = vpop.f32.mrf.mxu3  ;;  %vm542_vm8 = vweird.f32 %v1645_v17  ;;  %v765_v61 = vadd.f32 %v2211_v50, %v2233_v4 }
 0x271   :  { %1646 = vrcp.f32 %v339_v21  ;;  %v1008_v51 = vmul.f32 %v900_v39, %v814_v49  ;;  %v535_v42 = vsel %vm532_vm7, %v534_v45, %v530_v38  ;;  %vm543_vm10 = vmor %vm541_vm9, %vm542_vm8  ;;  %v561_v55 = vand.u32 2147483648, %v339_v21  ;;  %v959_v14 = vpop.f32.mrf.mxu0 }
 0x272   :  { %v538_v56 = vsub.f32 1.0, %v537_v0  ;;  %v577_v11 = vmul.f32 %v2175_v60, %v535_v42  ;;  %v559_v59 = vand.u32 2147483647, %v339_v21  ;;  %vm555_vm13 = vweird.f32 %v339_v21 }
 0x273   :  { %v1034_v16 = vpack.c.bf16 %v1008_v51, %v1006_v29  ;;  %v562_v6 = vor.u32 1.1754944e-38, %v561_v55  ;;  %v805_v27 = vmax.f32 %v765_v61, 0.0  ;;  %v772_v50 = vadd.f32 %v771_v5, %v2233_v4 }
 0x274   :  { %v539_v18 = vmul.f32 %v1645_v17, %v538_v56  ;;  %593 = vst [vmem:[#allocation14 + $0x68] sm:$0xff] %v577_v11  ;;  %923 = vmatmul.f32.gmra.mxu3 %v577_v11  ;;  %988 = vmatmul.f32.gmra.mxu0 %v577_v11  ;;  %vm560_vm15 = vcmp.eq.f32.partialorder %v559_v59, 8.507059e+37  ;;  %v776_v19 = vpop.f32.mrf.mxu2 }
 0x275   :  { %1149 = vmatmul.f32.gmra.mxu1 %v577_v11  ;;  %1273 = vmatmul.bf16.gmra.mxu2 %v1034_v16  ;;  %v999_v35 = vmul.f32 %v2224_v3, %v805_v27  ;;  %v811_v26 = vmax.f32 %v772_v50, 0.0  ;;  %v777_v0 = vadd.f32 %v776_v19, %v2233_v4  ;;  %v735_v16 = vpop.f32.mrf.mxu1 }
 0x276   :  { %v540_v36 = vadd.f32 %v1645_v17, %v539_v18 }
 0x277   :  { %v1647_v20 = vpop.eup %1646  ;;  %v1005_v28 = vmul.f32 %v959_v14, %v811_v26  ;;  %v815_v39 = vmax.f32 %v777_v0, 0.0 }
 0x278   :  { %v544_v40 = vsel %vm543_vm10, %v1645_v17, %v540_v36  ;;  %v551_v60 = vmul.f32 %v1647_v20, %v339_v21  ;;  %v903_v23 = vpop.f32.mrf.mxu3  ;;  %vm556_vm12 = vweird.f32 %v1647_v20  ;;  %v775_v21 = vadd.f32 %v774_v32, %v2233_v4 }
 0x279   :  { %v549_v47 = vsel %vm546_vm11, %v548_v48, %v544_v40  ;;  %vm557_vm14 = vmor %vm555_vm13, %vm556_vm12  ;;  %v1010_v46 = vmul.f32 %v903_v23, %v816_v62  ;;  %v962_v58 = vpop.f32.mrf.mxu0 }
 0x27a   :  { %v552_v54 = vsub.f32 1.0, %v551_v60  ;;  %v578_v44 = vmul.f32 %v2182_v25, %v549_v47  ;;  %v767_v25 = vadd.f32 %v2218_v43, %v2233_v4  ;;  %v813_v29 = vmax.f32 %v775_v21, 0.0 }
 0x27c   :  { %v553_v57 = vmul.f32 %v1647_v20, %v552_v54  ;;  %594 = vst [vmem:[#allocation14 + $0x70] sm:$0xff] %v578_v44  ;;  %926 = vmatmul.f32.gmra.mxu3 %v578_v44  ;;  %991 = vmatmul.f32.gmra.mxu0 %v578_v44  ;;  %v807_v15 = vmax.f32 %v767_v25, 0.0  ;;  %v779_v45 = vpop.f32.mrf.mxu2  ;;  %v1007_v42 = vmul.f32 %v962_v58, %v813_v29 }
 0x27d   :  { %1152 = vmatmul.f32.gmra.mxu1 %v578_v44  ;;  %v737_v53 = vpop.f32.mrf.mxu1 }
 0x27e   :  { %v554_v63 = vadd.f32 %v1647_v20, %v553_v57  ;;  %v1001_v43 = vmul.f32 %v953_v1, %v807_v15 }
 0x280   :  { %v558_v7 = vsel %vm557_vm14, %v1647_v20, %v554_v63  ;;  %v906_v10 = vpop.f32.mrf.mxu3  ;;  %v1031_v12 = vpack.c.bf16 %v1001_v43, %v999_v35  ;;  %v736_v63 = vadd.f32 %v735_v16, %v2197_v52 }
 0x281   :  { %v563_v8 = vsel %vm560_vm15, %v562_v6, %v558_v7  ;;  %v1012_v30 = vmul.f32 %v906_v10, %v818_v2  ;;  %v965_v3 = vpop.f32.mrf.mxu0  ;;  %v738_v6 = vadd.f32 %v737_v53, %v2197_v52 }
 0x282   :  { %v579_v22 = vmul.f32 %v2186_v31, %v563_v8  ;;  %v770_v31 = vadd.f32 %v2227_v41, %v2233_v4  ;;  %v1009_v51 = vmul.f32 %v965_v3, %v815_v39  ;;  %v780_v41 = vadd.f32 %v779_v45, %v2233_v4 }
 0x283   :  { %v1036_v13 = vpack.c.bf16 %v1012_v30, %v1010_v46  ;;  %v820_v10 = vmax.f32 %v736_v63, 0.0  ;;  %v822_v46 = vmax.f32 %v738_v6, 0.0 }
 0x284   :  { %595 = vst [vmem:[#allocation14 + $0x78] sm:$0xff] %v579_v22  ;;  %929 = vmatmul.f32.gmra.mxu3 %v579_v22  ;;  %994 = vmatmul.f32.gmra.mxu0 %v579_v22  ;;  %v809_v49 = vmax.f32 %v770_v31, 0.0  ;;  %v781_v56 = vpop.f32.mrf.mxu2  ;;  %v1035_v11 = vpack.c.bf16 %v1009_v51, %v1007_v42  ;;  %v817_v48 = vmax.f32 %v780_v41, 0.0 }
 0x285   :  { %1155 = vmatmul.f32.gmra.mxu1 %v579_v22  ;;  %1278 = vmatmul.bf16.gmra.mxu2 %v1036_v13  ;;  %v782_v33 = vadd.f32 %v781_v56, %v2233_v4  ;;  %v740_v47 = vpop.f32.mrf.mxu1  ;;  %1394 = dma.vmem_to_hbm [thread:$0]  %s1387_s22, 2048, %s1389_s25, [#allocation15], %s1853_s17, %s1853_s17, %s1854_s18  }
 0x286   :  { %v1003_v17 = vmul.f32 %v956_v24, %v809_v49  ;;  %v741_v31 = vadd.f32 %v740_v47, %v2197_v52 }
 0x287   :  { %v819_v36 = vmax.f32 %v782_v33, 0.0 }
 0x288   :  { %v1033_v38 = vpack.c.bf16 %v1005_v28, %v1003_v17  ;;  %v824_v17 = vmax.f32 %v741_v31, 0.0 }
 0x289   :  { %v968_v34 = vpop.f32.mrf.mxu0 }
 0x28a   :  { %v1011_v60 = vmul.f32 %v968_v34, %v817_v48 }
 0x28c   :  { %1312 = vmatmul.bf16.vlgmr.msrb.gmra.mxu3 %v1031_v12  ;;  %v784_v18 = vpop.f32.mrf.mxu2 }
 0x28d   :  { %v785_v54 = vadd.f32 %v784_v18, %v2233_v4  ;;  %v742_v57 = vpop.f32.mrf.mxu1 }
 0x28e   :  { %v743_v49 = vadd.f32 %v742_v57, %v2197_v52 }
 0x28f   :  { %v821_v59 = vmax.f32 %v785_v54, 0.0 }
 0x290   :  { %v826_v45 = vmax.f32 %v743_v49, 0.0 }
 0x291   :  { %v971_v20 = vpop.f32.mrf.mxu0 }
 0x292   :  { %v1013_v9 = vmul.f32 %v971_v20, %v819_v36 }
 0x294   :  { %v786_v40 = vpop.f32.mrf.mxu2  ;;  %v1037_v1 = vpack.c.bf16 %v1013_v9, %v1011_v60 }
 0x295   :  { %v787_v44 = vadd.f32 %v786_v40, %v2233_v4  ;;  %v745_v30 = vpop.f32.mrf.mxu1 }
 0x296   :  { %v746_v16 = vadd.f32 %v745_v30, %v2197_v52 }
 0x297   :  { %v823_v62 = vmax.f32 %v787_v44, 0.0 }
 0x298   :  { %v828_v40 = vmax.f32 %v746_v16, 0.0 }
 0x29c   :  { %1317 = vmatmul.bf16.gmra.mxu3 %v1033_v38  ;;  %v789_v23 = vpop.f32.mrf.mxu2 }
 0x29d   :  { %v790_v27 = vadd.f32 %v789_v23, %v2233_v4  ;;  %v747_v19 = vpop.f32.mrf.mxu1 }
 0x29e   :  { %v748_v36 = vadd.f32 %v747_v19, %v2197_v52 }
 0x29f   :  { %v825_v35 = vmax.f32 %v790_v27, 0.0 }
 0x2a4   :  { %v791_v55 = vpop.f32.mrf.mxu2 }
 0x2a5   :  { %v792_v43 = vadd.f32 %v791_v55, %v2233_v4  ;;  %v750_v34 = vpop.f32.mrf.mxu1 }
 0x2a6   :  { %v751_v6 = vadd.f32 %v750_v34, %v2197_v52 }
 0x2a7   :  { %v827_v12 = vmax.f32 %v792_v43, 0.0 }
 0x2ac   :  { %1322 = vmatmul.bf16.gmra.mxu3 %v1035_v11  ;;  %v794_v61 = vpop.f32.mrf.mxu2 }
 0x2ad   :  { %v795_v56 = vadd.f32 %v794_v61, %v2233_v4  ;;  %v752_v53 = vpop.f32.mrf.mxu1  ;;  %v832_v61 = vmax.f32 %v751_v6, 0.0 }
 0x2af   :  { %v829_v11 = vmax.f32 %v795_v56, 0.0 }
 0x2b4   :  { %v796_v14 = vpop.f32.mrf.mxu2 }
 0x2b5   :  { %v797_v51 = vadd.f32 %v796_v14, %v2233_v4  ;;  %v1111_v63 = vpop.f32.mrf.mxu1 }
 0x2b7   :  { %v831_v18 = vmax.f32 %v797_v51, 0.0 }
 0x2bc   :  { %1327 = vmatmul.bf16.gmra.mxu3 %v1037_v1  ;;  %v799_v39 = vpop.f32.mrf.mxu2  ;;  %v830_v1 = vmax.f32 %v748_v36, 0.0 }
 0x2bd   :  { %v800_v44 = vadd.f32 %v799_v39, %v2233_v4 }
 0x2c4   :  { %v801_v9 = vpop.f32.mrf.mxu2 }
 0x2c5   :  { %v802_v55 = vadd.f32 %v801_v9, %v2233_v4 }
 0x2c9   :  { %v974_v37 = vpop.f32.mrf.mxu0 }
 0x2ca   :  { %v1015_v25 = vmul.f32 %v974_v37, %v821_v59 }
 0x2cf   :  { %v909_v2 = vpop.f32.mrf.mxu3 }
 0x2d0   :  { %v1014_v24 = vmul.f32 %v909_v2, %v820_v10  ;;  %v835_v2 = vmax.f32 %v802_v55, 0.0 }
 0x2d1   :  { %v977_v5 = vpop.f32.mrf.mxu0 }
 0x2d2   :  { %v1017_v7 = vmul.f32 %v977_v5, %v823_v62  ;;  %v833_v62 = vmax.f32 %v800_v44, 0.0 }
 0x2d4   :  { %v1039_v8 = vpack.c.bf16 %v1017_v7, %v1015_v25  ;;  %v753_v7 = vadd.f32 %v752_v53, %v2197_v52 }
 0x2d6   :  { %1332 = vmatmul.bf16.gmra.mxu3 %v1039_v8  ;;  %v834_v30 = vmax.f32 %v753_v7, 0.0 }
 0x2d7   :  { %v912_v22 = vpop.f32.mrf.mxu3 }
 0x2d8   :  { %v1016_v15 = vmul.f32 %v912_v22, %v822_v46  ;;  %v1264_v59 = vpop.f32.mrf.mxu2 }
 0x2d9   :  { %v980_v13 = vpop.f32.mrf.mxu0  ;;  %v1265_v43 = vadd.f32 %v1264_v59, %v1111_v63 }
 0x2da   :  { %v1038_v32 = vpack.c.bf16 %v1016_v15, %v1014_v24  ;;  %v1019_v58 = vmul.f32 %v980_v13, %v825_v35  ;;  %v1114_v13 = vpop.f32.mrf.mxu1 }
 0x2dc   :  { %1283 = vmatmul.bf16.gmra.mxu2 %v1038_v32 }
 0x2df   :  { %v915_v50 = vpop.f32.mrf.mxu3 }
 0x2e0   :  { %v1018_v3 = vmul.f32 %v915_v50, %v824_v17  ;;  %v1266_v22 = vpop.f32.mrf.mxu2 }
 0x2e1   :  { %v983_v26 = vpop.f32.mrf.mxu0  ;;  %v1267_v52 = vadd.f32 %v1266_v22, %v1114_v13 }
 0x2e2   :  { %v1021_v28 = vmul.f32 %v983_v26, %v827_v12  ;;  %v1117_v14 = vpop.f32.mrf.mxu1 }
 0x2e4   :  { %v1041_v38 = vpack.c.bf16 %v1021_v28, %v1019_v58 }
 0x2e6   :  { %1337 = vmatmul.bf16.gmra.mxu3 %v1041_v38 }
 0x2e7   :  { %v918_v0 = vpop.f32.mrf.mxu3 }
 0x2e8   :  { %v1020_v21 = vmul.f32 %v918_v0, %v826_v45  ;;  %v1269_v12 = vpop.f32.mrf.mxu2 }
 0x2e9   :  { %v986_v29 = vpop.f32.mrf.mxu0  ;;  %v1270_v49 = vadd.f32 %v1269_v12, %v1117_v14 }
 0x2ea   :  { %v1040_v42 = vpack.c.bf16 %v1020_v21, %v1018_v3  ;;  %v1023_v20 = vmul.f32 %v986_v29, %v829_v11  ;;  %v1120_v26 = vpop.f32.mrf.mxu1 }
 0x2ec   :  { %1288 = vmatmul.bf16.gmra.mxu2 %v1040_v42 }
 0x2ef   :  { %v921_v33 = vpop.f32.mrf.mxu3 }
 0x2f0   :  { %v1022_v47 = vmul.f32 %v921_v33, %v828_v40  ;;  %v1271_v19 = vpop.f32.mrf.mxu2 }
 0x2f1   :  { %v989_v41 = vpop.f32.mrf.mxu0  ;;  %v1272_v38 = vadd.f32 %v1271_v19, %v1120_v26 }
 0x2f2   :  { %v1025_v48 = vmul.f32 %v989_v41, %v831_v18  ;;  %v1123_v45 = vpop.f32.mrf.mxu1 }
 0x2f4   :  { %v1043_v60 = vpack.c.bf16 %v1025_v48, %v1023_v20 }
 0x2f6   :  { %1342 = vmatmul.bf16.gmra.mxu3 %v1043_v60 }
 0x2f7   :  { %v924_v23 = vpop.f32.mrf.mxu3 }
 0x2f8   :  { %v1024_v37 = vmul.f32 %v924_v23, %v830_v1  ;;  %v1274_v17 = vpop.f32.mrf.mxu2 }
 0x2f9   :  { %v992_v54 = vpop.f32.mrf.mxu0  ;;  %v1275_v21 = vadd.f32 %v1274_v17, %v1123_v45 }
 0x2fa   :  { %v1042_v57 = vpack.c.bf16 %v1024_v37, %v1022_v47  ;;  %v1027_v10 = vmul.f32 %v992_v54, %v833_v62  ;;  %v1126_v51 = vpop.f32.mrf.mxu1 }
 0x2fc   :  { %1293 = vmatmul.bf16.gmra.mxu2 %v1042_v57 }
 0x2ff   :  { %v927_v5 = vpop.f32.mrf.mxu3 }
 0x300   :  { %v1026_v24 = vmul.f32 %v927_v5, %v832_v61  ;;  %v1276_v39 = vpop.f32.mrf.mxu2 }
 0x301   :  { %v995_v25 = vpop.f32.mrf.mxu0  ;;  %v1277_v42 = vadd.f32 %v1276_v39, %v1126_v51 }
 0x302   :  { %v1029_v8 = vmul.f32 %v995_v25, %v835_v2  ;;  %v1129_v33 = vpop.f32.mrf.mxu1 }
 0x304   :  { %v1045_v46 = vpack.c.bf16 %v1029_v8, %v1027_v10 }
 0x306   :  { %1347 = vmatmul.bf16.gmra.mxu3 %v1045_v46 }
 0x307   :  { %v930_v4 = vpop.f32.mrf.mxu3 }
 0x308   :  { %v1028_v15 = vmul.f32 %v930_v4, %v834_v30  ;;  %v1279_v18 = vpop.f32.mrf.mxu2 }
 0x309   :  { %v1280_v16 = vadd.f32 %v1279_v18, %v1129_v33 }
 0x30a   :  { %v1044_v27 = vpack.c.bf16 %v1028_v15, %v1026_v24  ;;  %v1132_v48 = vpop.f32.mrf.mxu1 }
 0x30c   :  { %1298 = vmatmul.bf16.gmra.mxu2 %v1044_v27 }
 0x30f   :  { %v1313_v32 = vpop.f32.mrf.mxu3 }
 0x310   :  { %v1314_v35 = vadd.f32 %v1313_v32, %v1265_v43  ;;  %v1281_v20 = vpop.f32.mrf.mxu2 }
 0x311   :  { %v1282_v9 = vadd.f32 %v1281_v20, %v1132_v48 }
 0x312   :  { %1353 = vst [vmem:[#allocation13] sm:$0xff] %v1314_v35  ;;  %v1135_v53 = vpop.f32.mrf.mxu1 }
 0x317   :  { %v1315_v50 = vpop.f32.mrf.mxu3 }
 0x318   :  { %v1316_v31 = vadd.f32 %v1315_v50, %v1267_v52 }
 0x31a   :  { %1354 = vst [vmem:[#allocation13 + $0x8] sm:$0xff] %v1316_v31  ;;  %v1138_v23 = vpop.f32.mrf.mxu1 }
 0x31f   :  { %v1318_v58 = vpop.f32.mrf.mxu3 }
 0x320   :  { %v1319_v28 = vadd.f32 %v1318_v58, %v1270_v49 }
 0x322   :  { %1355 = vst [vmem:[#allocation13 + $0x10] sm:$0xff] %v1319_v28  ;;  %v1141_v55 = vpop.f32.mrf.mxu1 }
 0x327   :  { %v1320_v0 = vpop.f32.mrf.mxu3 }
 0x328   :  { %v1321_v3 = vadd.f32 %v1320_v0, %v1272_v38 }
 0x32a   :  { %1356 = vst [vmem:[#allocation13 + $0x18] sm:$0xff] %v1321_v3  ;;  %v1144_v63 = vpop.f32.mrf.mxu1 }
 0x32f   :  { %v1323_v29 = vpop.f32.mrf.mxu3 }
 0x330   :  { %v1324_v56 = vadd.f32 %v1323_v29, %v1275_v21 }
 0x332   :  { %1357 = vst [vmem:[#allocation13 + $0x20] sm:$0xff] %v1324_v56  ;;  %v1147_v61 = vpop.f32.mrf.mxu1 }
 0x337   :  { %v1325_v34 = vpop.f32.mrf.mxu3 }
 0x338   :  { %v1326_v11 = vadd.f32 %v1325_v34, %v1277_v42 }
 0x33a   :  { %1358 = vst [vmem:[#allocation13 + $0x28] sm:$0xff] %v1326_v11  ;;  %v1150_v15 = vpop.f32.mrf.mxu1 }
 0x33f   :  { %v1328_v41 = vpop.f32.mrf.mxu3 }
 0x340   :  { %v1329_v36 = vadd.f32 %v1328_v41, %v1280_v16 }
 0x342   :  { %1359 = vst [vmem:[#allocation13 + $0x30] sm:$0xff] %v1329_v36  ;;  %v1153_v35 = vpop.f32.mrf.mxu1 }
 0x347   :  { %v1330_v40 = vpop.f32.mrf.mxu3 }
 0x348   :  { %v1331_v60 = vadd.f32 %v1330_v40, %v1282_v9 }
 0x34a   :  { %1360 = vst [vmem:[#allocation13 + $0x38] sm:$0xff] %v1331_v60  ;;  %v1156_v31 = vpop.f32.mrf.mxu1 }
 0x359   :  { %v1333_v1 = vpop.f32.mrf.mxu3 }
 0x35f   :  { %v1284_v47 = vpop.f32.mrf.mxu2 }
 0x360   :  { %v1285_v37 = vadd.f32 %v1284_v47, %v1135_v53 }
 0x361   :  { %v1335_v54 = vpop.f32.mrf.mxu3 }
 0x362   :  { %v1334_v44 = vadd.f32 %v1333_v1, %v1285_v37 }
 0x364   :  { %1361 = vst [vmem:[#allocation13 + $0x40] sm:$0xff] %v1334_v44 }
 0x367   :  { %v1286_v57 = vpop.f32.mrf.mxu2 }
 0x368   :  { %v1287_v59 = vadd.f32 %v1286_v57, %v1138_v23 }
 0x369   :  { %v1338_v62 = vpop.f32.mrf.mxu3 }
 0x36a   :  { %v1336_v2 = vadd.f32 %v1335_v54, %v1287_v59 }
 0x36c   :  { %1362 = vst [vmem:[#allocation13 + $0x48] sm:$0xff] %v1336_v2 }
 0x36f   :  { %v1289_v5 = vpop.f32.mrf.mxu2 }
 0x370   :  { %v1290_v6 = vadd.f32 %v1289_v5, %v1141_v55 }
 0x371   :  { %v1340_v25 = vpop.f32.mrf.mxu3 }
 0x372   :  { %v1339_v7 = vadd.f32 %v1338_v62, %v1290_v6 }
 0x374   :  { %1363 = vst [vmem:[#allocation13 + $0x50] sm:$0xff] %v1339_v7 }
 0x377   :  { %v1291_v10 = vpop.f32.mrf.mxu2 }
 0x378   :  { %v1292_v8 = vadd.f32 %v1291_v10, %v1144_v63 }
 0x379   :  { %v1343_v30 = vpop.f32.mrf.mxu3 }
 0x37a   :  { %v1341_v46 = vadd.f32 %v1340_v25, %v1292_v8 }
 0x37c   :  { %1364 = vst [vmem:[#allocation13 + $0x58] sm:$0xff] %v1341_v46 }
 0x37f   :  { %v1294_v22 = vpop.f32.mrf.mxu2 }
 0x380   :  { %v1295_v4 = vadd.f32 %v1294_v22, %v1147_v61 }
 0x381   :  { %v1345_v13 = vpop.f32.mrf.mxu3 }
 0x382   :  { %v1344_v24 = vadd.f32 %v1343_v30, %v1295_v4 }
 0x384   :  { %1365 = vst [vmem:[#allocation13 + $0x60] sm:$0xff] %v1344_v24 }
 0x387   :  { %v1296_v27 = vpop.f32.mrf.mxu2 }
 0x388   :  { %v1297_v43 = vadd.f32 %v1296_v27, %v1150_v15 }
 0x389   :  { %v1348_v12 = vpop.f32.mrf.mxu3 }
 0x38a   :  { %v1346_v32 = vadd.f32 %v1345_v13, %v1297_v43 }
 0x38c   :  { %1366 = vst [vmem:[#allocation13 + $0x68] sm:$0xff] %v1346_v32 }
 0x38f   :  { %v1299_v14 = vpop.f32.mrf.mxu2 }
 0x390   :  { %v1300_v52 = vadd.f32 %v1299_v14, %v1153_v35 }
 0x391   :  { %v1350_v49 = vpop.f32.mrf.mxu3 }
 0x392   :  { %v1349_v50 = vadd.f32 %v1348_v12, %v1300_v52 }
 0x394   :  { %1367 = vst [vmem:[#allocation13 + $0x70] sm:$0xff] %v1349_v50 }
 0x397   :  { %v1301_v19 = vpop.f32.mrf.mxu2 }
 0x398   :  { %v1302_v26 = vadd.f32 %v1301_v19, %v1156_v31 }
 0x39a   :  { %v1351_v58 = vadd.f32 %v1350_v49, %v1302_v26 }
 0x39c   :  { %1368 = vst [vmem:[#allocation13 + $0x78] sm:$0xff] %v1351_v58 }
 0x39d   :  { %1381 = dma.vmem_to_hbm [thread:$0]  %s1374_s5, 2048, %s1376_s28, [#allocation4], %s1853_s17, %s1853_s17, %s1854_s18  }
 0x39e   :  { %1848 = dma.done.wait [#allocation4], 2048  }
 0x39f   :  { %1849 = vsyncadd [#allocation4], 4294965248 }
 0x3a0   :  { %1850 = dma.done.wait [#allocation15], 2048  }
 0x3a1   :  { %1851 = vsyncadd [#allocation15], 4294965248 }
 0x3a2   :  { %1403 = vsyncpa [#allocation3], 1 }
 0x3a3   :  { %1404 = vsyncpa [#allocation6], 1 }
 0x3a4   :  { %1405 = vsyncpa [#allocation9], 1 }
 0x3a5   :  { %1406 = vsyncpa [#allocation12], 1 }
 0x3a6   :  { %1407 = vsyncpa [#allocation4], 1 }
 0x3a7   :  { %1408 = vsyncpa [#allocation15], 1 }

</bundles_post_ra>
